<compile_context>
chip_gen: v6e
topology: v6e:2x2x1
jax: 0.10.0
libtpu: 0.0.40
codegen_flags: <defaults>
</compile_context>

<pallas_src>
import functools

import jax
import jax.numpy as jnp
from jax import lax
from jax.experimental import pallas as pl
from jax.experimental.pallas import tpu as pltpu


def _round_up(v, m):
    return (v + m - 1) // m * m


# ---------------------------------------------------------------------------
# Fused RDB kernel
# ---------------------------------------------------------------------------
def _rdb_fused_kernel(*refs, num_layers, Wp, GUARD, LANES, roffs, G_pad, C_pad):
    x_ref = refs[0]                            # (1, C_pad, LANES) padded input
    mask_ref = refs[1]                         # (1, LANES) 1.0 at interior px
    dense_refs = refs[2:2 + 2 * num_layers]    # per layer: w (9,G_pad,rows_in), b (G_pad,1)
    w1_ref = refs[2 + 2 * num_layers]          # (C_pad, rows_total)
    b1_ref = refs[3 + 2 * num_layers]          # (C_pad, 1)
    o_ref = refs[4 + 2 * num_layers]           # (1, C_pad, LANES)
    buf = refs[5 + 2 * num_layers]             # VMEM (rows_total, 2*GUARD+LANES)

    interior = mask_ref[...] != 0.0            # (1, LANES) bool, broadcasts over rows

    # Group 0: the zero-padded input (channels already padded to C_pad, lanes
    # to LANES, 1-px spatial border zero).  Fully overwrites its rows each step.
    buf[0:C_pad, GUARD:GUARD + LANES] = x_ref[0].astype(jnp.float32)

    # Dense layers: 9 accumulating MXU dots on lane-shifted views of buf,
    # then bias + ReLU, then append (sublane-aligned group, lane-aligned store).
    for l in range(num_layers):
        rows_in = roffs[l + 1]                 # padded rows of groups 0..l
        out_off = roffs[l + 1]                 # group l+1 starts here
        w_ref = dense_refs[2 * l]
        b_ref = dense_refs[2 * l + 1]

        acc = jnp.zeros((G_pad, LANES), jnp.float32)
        for t in range(9):
            dy, dx = t // 3, t % 3
            start = GUARD + (dy - 1) * Wp + (dx - 1)
            acc = acc + jnp.dot(w_ref[t], buf[0:rows_in, start:start + LANES],
                                preferred_element_type=jnp.float32)
        y = jnp.maximum(acc + b_ref[...], 0.0)
        # Select (not multiply) forces the 1-px border (and lane padding) to
        # exact zero even if guard-lane garbage produced NaN/Inf in acc there;
        # that zero border is the next layer's conv padding.
        buf[out_off:out_off + G_pad, GUARD:GUARD + LANES] = \
            jnp.where(interior, y, 0.0)

    # Final 1x1 conv over the full (padded-row) concatenation + residual add.
    feat = buf[:, GUARD:GUARD + LANES]
    out = jnp.dot(w1_ref[...], feat, preferred_element_type=jnp.float32)
    out = out + b1_ref[...] + buf[0:C_pad, GUARD:GUARD + LANES]
    o_ref[0] = out.astype(o_ref.dtype)         # lane-dense (LANES % 128 == 0) store


# ---------------------------------------------------------------------------
# Wrapper
# ---------------------------------------------------------------------------
def rdb_forward(params, x_nchw):
    """Matches RDB.forward: dense (conv3x3+ReLU, concat) layers, conv1x1, + x."""
    N, C, H, W = x_nchw.shape
    dense = params["dense"]
    L = len(dense)
    growth = dense[0][0].shape[-1]
    Hp, Wp = H + 2, W + 2
    HpWp = Hp * Wp

    LANES = _round_up(HpWp, 128)   # lane-aligned flattened padded-spatial extent
    GUARD = _round_up(Wp + 1, 128)  # lane-aligned image-zone start inside buf
    C_pad = _round_up(C, 8)
    G_pad = _round_up(growth, 8)

    # Padded row offsets of each channel group inside the VMEM concat buffer.
    group_sizes = [C] + [growth] * L
    group_pads = [C_pad] + [G_pad] * L
    roffs = [0]
    for p in group_pads:
        roffs.append(roffs[-1] + p)
    rows_total = roffs[-1]

    # Input: pad channels to C_pad, spatial by 1px, flatten, pad lanes to LANES.
    xg = jnp.pad(x_nchw, ((0, 0), (0, C_pad - C), (1, 1), (1, 1)))
    xg = xg.reshape(N, C_pad, HpWp)
    xg = jnp.pad(xg, ((0, 0), (0, 0), (0, LANES - HpWp))).astype(jnp.float32)

    # 1.0 at interior pixels of the padded grid, 0.0 on the border / lane pad.
    mask = jnp.zeros((Hp, Wp), jnp.float32).at[1:H + 1, 1:W + 1].set(1.0)
    mask = jnp.pad(mask.reshape(1, HpWp), ((0, 0), (0, LANES - HpWp)))

    def pad_channel_cols(m2d, n_groups):
        # m2d: (rows, sum(group_sizes[:n_groups])) -> (rows, roffs[n_groups])
        # with each group's columns placed at its 8-aligned padded offset.
        chunks = []
        cstart = 0
        for g in range(n_groups):
            sz, pd = group_sizes[g], group_pads[g]
            chunks.append(m2d[:, cstart:cstart + sz])
            if pd > sz:
                chunks.append(jnp.zeros((m2d.shape[0], pd - sz), m2d.dtype))
            cstart += sz
        return jnp.concatenate(chunks, axis=1)

    args = [xg, mask]
    in_specs = [
        pl.BlockSpec((1, C_pad, LANES), lambda n: (n, 0, 0)),
        pl.BlockSpec((1, LANES), lambda n: (0, 0)),
    ]

    for l, (w, b) in enumerate(dense):
        cin = w.shape[2]
        rows_in = roffs[l + 1]
        # (3,3,cin,growth) -> per-tap (growth, cin) -> scatter input channels to
        # their padded buffer rows -> pad output channels (M dim) to G_pad.
        wt = jnp.transpose(w.reshape(9, cin, growth), (0, 2, 1))
        wt = jnp.stack([pad_channel_cols(wt[t], l + 1) for t in range(9)])
        wt = jnp.pad(wt, ((0, 0), (0, G_pad - growth), (0, 0)))
        bp = jnp.pad(b.reshape(growth, 1), ((0, G_pad - growth), (0, 0)))
        args += [wt, bp]
        in_specs += [pl.BlockSpec((9, G_pad, rows_in), lambda n: (0, 0, 0)),
                     pl.BlockSpec((G_pad, 1), lambda n: (0, 0))]

    w1 = params["conv1x1_w"]                    # (c_total, C)
    w1p = pad_channel_cols(w1.T, L + 1)         # (C, rows_total)
    w1p = jnp.pad(w1p, ((0, C_pad - C), (0, 0)))
    b1p = jnp.pad(params["conv1x1_b"].reshape(C, 1), ((0, C_pad - C), (0, 0)))
    args += [w1p, b1p]
    in_specs += [pl.BlockSpec((C_pad, rows_total), lambda n: (0, 0)),
                 pl.BlockSpec((C_pad, 1), lambda n: (0, 0))]

    kernel = functools.partial(
        _rdb_fused_kernel, num_layers=L, Wp=Wp, GUARD=GUARD, LANES=LANES,
        roffs=tuple(roffs), G_pad=G_pad, C_pad=C_pad)

    out_p = pl.pallas_call(
        kernel,
        out_shape=jax.ShapeDtypeStruct((N, C_pad, LANES), x_nchw.dtype),
        grid=(N,),
        in_specs=in_specs,
        out_specs=pl.BlockSpec((1, C_pad, LANES), lambda n: (n, 0, 0)),
        scratch_shapes=[
            pltpu.VMEM((rows_total, 2 * GUARD + LANES), jnp.float32),  # concat buf
        ],
        compiler_params=pltpu.CompilerParams(
            dimension_semantics=("parallel",)),
    )(*args)

    # Drop channel / lane padding and the 1-px spatial border.
    out = out_p[:, :C, :HpWp].reshape(N, C, Hp, Wp)
    return out[:, :, 1:H + 1, 1:W + 1]


# ---------------------------------------------------------------------------
# Parameter init (PyTorch Conv2d-style uniform init, kernel-friendly layouts)
# ---------------------------------------------------------------------------
def init_rdb_params(key, in_channels, num_dense_layer, growth_rate):
    params = {"dense": []}
    c = in_channels
    for _ in range(num_dense_layer):
        key, kw, kb = jax.random.split(key, 3)
        fan_in = c * 3 * 3
        bound = 1.0 / jnp.sqrt(fan_in)
        w = jax.random.uniform(kw, (3, 3, c, growth_rate), jnp.float32,
                               -bound, bound)
        b = jax.random.uniform(kb, (growth_rate,), jnp.float32, -bound, bound)
        params["dense"].append((w, b))
        c += growth_rate
    key, kw, kb = jax.random.split(key, 3)
    bound = 1.0 / jnp.sqrt(c)
    params["conv1x1_w"] = jax.random.uniform(kw, (c, in_channels), jnp.float32,
                                             -bound, bound)
    params["conv1x1_b"] = jax.random.uniform(kb, (in_channels,), jnp.float32,
                                             -bound, bound)
    return params


# ---------------------------------------------------------------------------
# Pure-JAX reference (correctness check only)
# ---------------------------------------------------------------------------
def _ref_conv_nchw(x, w_hwio, b, pad):
    y = lax.conv_general_dilated(
        x, w_hwio, window_strides=(1, 1),
        padding=[(pad, pad), (pad, pad)],
        dimension_numbers=("NCHW", "HWIO", "NCHW"))
    return y + b.reshape(1, -1, 1, 1)


def rdb_reference(params, x_nchw):
    out = x_nchw
    for (w, b) in params["dense"]:
        y = jnp.maximum(_ref_conv_nchw(out, w, b, 1), 0.0)
        out = jnp.concatenate([out, y], axis=1)
    w1 = params["conv1x1_w"].reshape(1, 1, *params["conv1x1_w"].shape)
    out = _ref_conv_nchw(out, w1, params["conv1x1_b"], 0)
    return out + x_nchw


# ---------------------------------------------------------------------------
if __name__ == "__main__":
    key = jax.random.PRNGKey(0)
    key, kx, kp = jax.random.split(key, 3)

    N, C, H, W = 2, 4, 16, 16
    num_dense_layer, growth_rate = 3, 4

    x = jax.random.normal(kx, (N, C, H, W), jnp.float32)  # NCHW like PyTorch
    params = init_rdb_params(kp, C, num_dense_layer, growth_rate)

    out = jax.block_until_ready(rdb_forward(params, x))
    assert out.shape == (N, C, H, W), out.shape

    ref = jax.block_until_ready(rdb_reference(params, x))
    assert jnp.allclose(out, ref, atol=1e-3, rtol=1e-3), (
        float(jnp.max(jnp.abs(out - ref))))

    print("KERNEL_OK")
</pallas_src>

<mosaic_0001>
module attributes {stable_mosaic.version = 11 : i64} {
  func.func @_rdb_fused_kernel(%arg0: i32, %arg1: memref<1x8x384xf32, #tpu.memory_space<vmem>>, %arg2: memref<1x384xf32, #tpu.memory_space<vmem>>, %arg3: memref<9x8x8xf32, #tpu.memory_space<vmem>>, %arg4: memref<8x1xf32, #tpu.memory_space<vmem>>, %arg5: memref<9x8x16xf32, #tpu.memory_space<vmem>>, %arg6: memref<8x1xf32, #tpu.memory_space<vmem>>, %arg7: memref<9x8x24xf32, #tpu.memory_space<vmem>>, %arg8: memref<8x1xf32, #tpu.memory_space<vmem>>, %arg9: memref<8x32xf32, #tpu.memory_space<vmem>>, %arg10: memref<8x1xf32, #tpu.memory_space<vmem>>, %arg11: memref<1x8x384xf32, #tpu.memory_space<vmem>>, %arg12: memref<32x640xf32, #tpu.memory_space<vmem>>) attributes {dimension_semantics = [#tpu.dimension_semantics<parallel>], iteration_bounds = array<i64: 2>, scalar_prefetch = 0 : i64, scratch_operands = 1 : i64, tpu.core_type = #tpu.core_type<tc>, window_params = [{transform_indices = @transform_0, window_bounds = array<i64: 1, 8, 384>}, {pipeline_mode = #tpu.pipeline_mode<synchronous>, transform_indices = @transform_1, window_bounds = array<i64: 1, 384>}, {pipeline_mode = #tpu.pipeline_mode<synchronous>, transform_indices = @transform_2, window_bounds = array<i64: 9, 8, 8>}, {pipeline_mode = #tpu.pipeline_mode<synchronous>, transform_indices = @transform_3, window_bounds = array<i64: 8, 1>}, {pipeline_mode = #tpu.pipeline_mode<synchronous>, transform_indices = @transform_4, window_bounds = array<i64: 9, 8, 16>}, {pipeline_mode = #tpu.pipeline_mode<synchronous>, transform_indices = @transform_5, window_bounds = array<i64: 8, 1>}, {pipeline_mode = #tpu.pipeline_mode<synchronous>, transform_indices = @transform_6, window_bounds = array<i64: 9, 8, 24>}, {pipeline_mode = #tpu.pipeline_mode<synchronous>, transform_indices = @transform_7, window_bounds = array<i64: 8, 1>}, {pipeline_mode = #tpu.pipeline_mode<synchronous>, transform_indices = @transform_8, window_bounds = array<i64: 8, 32>}, {pipeline_mode = #tpu.pipeline_mode<synchronous>, transform_indices = @transform_9, window_bounds = array<i64: 8, 1>}, {transform_indices = @transform_10, window_bounds = array<i64: 1, 8, 384>}]} {
    %c0 = arith.constant 0 : index
    %c0_0 = arith.constant 0 : index
    %0 = vector.load %arg2[%c0, %c0_0] : memref<1x384xf32, #tpu.memory_space<vmem>>, vector<1x384xf32>
    %cst = arith.constant 0.000000e+00 : f32
    %1 = vector.broadcast %cst : f32 to vector<1x384xf32>
    %2 = arith.cmpf one, %0, %1 : vector<1x384xf32>
    %c0_1 = arith.constant 0 : index
    %c0_2 = arith.constant 0 : index
    %c0_3 = arith.constant 0 : index
    %3 = vector.load %arg1[%c0_1, %c0_2, %c0_3] : memref<1x8x384xf32, #tpu.memory_space<vmem>>, vector<1x8x384xf32>
    %4 = vector.shape_cast %3 : vector<1x8x384xf32> to vector<8x384xf32>
    %c0_4 = arith.constant 0 : index
    %c128 = arith.constant 128 : index
    %5 = vector.load %arg12[%c0_4, %c128] : memref<32x640xf32, #tpu.memory_space<vmem>>, vector<8x384xf32>
    tpu.vector_store %arg12[%c0_4, %c128], %4 {strides = array<i32>} : memref<32x640xf32, #tpu.memory_space<vmem>>, vector<8x384xf32>,
    %cst_5 = arith.constant 0.000000e+00 : f32
    %6 = vector.broadcast %cst_5 : f32 to vector<8x384xf32>
    %c0_6 = arith.constant 0 : index
    %c0_7 = arith.constant 0 : index
    %c0_8 = arith.constant 0 : index
    %7 = vector.load %arg3[%c0_6, %c0_7, %c0_8] : memref<9x8x8xf32, #tpu.memory_space<vmem>>, vector<1x8x8xf32>
    %8 = vector.shape_cast %7 : vector<1x8x8xf32> to vector<8x8xf32>
    %c0_9 = arith.constant 0 : index
    %c109 = arith.constant 109 : index
    %9 = vector.load %arg12[%c0_9, %c109] : memref<32x640xf32, #tpu.memory_space<vmem>>, vector<8x384xf32>
    %cst_10 = arith.constant dense<0.000000e+00> : vector<8x384xf32>
    %10 = tpu.matmul %8, %9, %cst_10 {dimension_numbers = #tpu.dot_dimension_numbers<[1], [0], [0], [1], [0, 0, 1, 1], [], []>} : vector<8x8xf32>, vector<8x384xf32>, vector<8x384xf32> -> vector<8x384xf32>
    %11 = arith.addf %6, %10 : vector<8x384xf32>
    %c1 = arith.constant 1 : index
    %c0_11 = arith.constant 0 : index
    %c0_12 = arith.constant 0 : index
    %12 = vector.load %arg3[%c1, %c0_11, %c0_12] : memref<9x8x8xf32, #tpu.memory_space<vmem>>, vector<1x8x8xf32>
    %13 = vector.shape_cast %12 : vector<1x8x8xf32> to vector<8x8xf32>
    %c0_13 = arith.constant 0 : index
    %c110 = arith.constant 110 : index
    %14 = vector.load %arg12[%c0_13, %c110] : memref<32x640xf32, #tpu.memory_space<vmem>>, vector<8x384xf32>
    %cst_14 = arith.constant dense<0.000000e+00> : vector<8x384xf32>
    %15 = tpu.matmul %13, %14, %cst_14 {dimension_numbers = #tpu.dot_dimension_numbers<[1], [0], [0], [1], [0, 0, 1, 1], [], []>} : vector<8x8xf32>, vector<8x384xf32>, vector<8x384xf32> -> vector<8x384xf32>
    %16 = arith.addf %11, %15 : vector<8x384xf32>
    %c2 = arith.constant 2 : index
    %c0_15 = arith.constant 0 : index
    %c0_16 = arith.constant 0 : index
    %17 = vector.load %arg3[%c2, %c0_15, %c0_16] : memref<9x8x8xf32, #tpu.memory_space<vmem>>, vector<1x8x8xf32>
    %18 = vector.shape_cast %17 : vector<1x8x8xf32> to vector<8x8xf32>
    %c0_17 = arith.constant 0 : index
    %c111 = arith.constant 111 : index
    %19 = vector.load %arg12[%c0_17, %c111] : memref<32x640xf32, #tpu.memory_space<vmem>>, vector<8x384xf32>
    %cst_18 = arith.constant dense<0.000000e+00> : vector<8x384xf32>
    %20 = tpu.matmul %18, %19, %cst_18 {dimension_numbers = #tpu.dot_dimension_numbers<[1], [0], [0], [1], [0, 0, 1, 1], [], []>} : vector<8x8xf32>, vector<8x384xf32>, vector<8x384xf32> -> vector<8x384xf32>
    %21 = arith.addf %16, %20 : vector<8x384xf32>
    %c3 = arith.constant 3 : index
    %c0_19 = arith.constant 0 : index
    %c0_20 = arith.constant 0 : index
    %22 = vector.load %arg3[%c3, %c0_19, %c0_20] : memref<9x8x8xf32, #tpu.memory_space<vmem>>, vector<1x8x8xf32>
    %23 = vector.shape_cast %22 : vector<1x8x8xf32> to vector<8x8xf32>
    %c0_21 = arith.constant 0 : index
    %c127 = arith.constant 127 : index
    %24 = vector.load %arg12[%c0_21, %c127] : memref<32x640xf32, #tpu.memory_space<vmem>>, vector<8x384xf32>
    %cst_22 = arith.constant dense<0.000000e+00> : vector<8x384xf32>
    %25 = tpu.matmul %23, %24, %cst_22 {dimension_numbers = #tpu.dot_dimension_numbers<[1], [0], [0], [1], [0, 0, 1, 1], [], []>} : vector<8x8xf32>, vector<8x384xf32>, vector<8x384xf32> -> vector<8x384xf32>
    %26 = arith.addf %21, %25 : vector<8x384xf32>
    %c4 = arith.constant 4 : index
    %c0_23 = arith.constant 0 : index
    %c0_24 = arith.constant 0 : index
    %27 = vector.load %arg3[%c4, %c0_23, %c0_24] : memref<9x8x8xf32, #tpu.memory_space<vmem>>, vector<1x8x8xf32>
    %28 = vector.shape_cast %27 : vector<1x8x8xf32> to vector<8x8xf32>
    %c0_25 = arith.constant 0 : index
    %c128_26 = arith.constant 128 : index
    %29 = vector.load %arg12[%c0_25, %c128_26] : memref<32x640xf32, #tpu.memory_space<vmem>>, vector<8x384xf32>
    %cst_27 = arith.constant dense<0.000000e+00> : vector<8x384xf32>
    %30 = tpu.matmul %28, %29, %cst_27 {dimension_numbers = #tpu.dot_dimension_numbers<[1], [0], [0], [1], [0, 0, 1, 1], [], []>} : vector<8x8xf32>, vector<8x384xf32>, vector<8x384xf32> -> vector<8x384xf32>
    %31 = arith.addf %26, %30 : vector<8x384xf32>
    %c5 = arith.constant 5 : index
    %c0_28 = arith.constant 0 : index
    %c0_29 = arith.constant 0 : index
    %32 = vector.load %arg3[%c5, %c0_28, %c0_29] : memref<9x8x8xf32, #tpu.memory_space<vmem>>, vector<1x8x8xf32>
    %33 = vector.shape_cast %32 : vector<1x8x8xf32> to vector<8x8xf32>
    %c0_30 = arith.constant 0 : index
    %c129 = arith.constant 129 : index
    %34 = vector.load %arg12[%c0_30, %c129] : memref<32x640xf32, #tpu.memory_space<vmem>>, vector<8x384xf32>
    %cst_31 = arith.constant dense<0.000000e+00> : vector<8x384xf32>
    %35 = tpu.matmul %33, %34, %cst_31 {dimension_numbers = #tpu.dot_dimension_numbers<[1], [0], [0], [1], [0, 0, 1, 1], [], []>} : vector<8x8xf32>, vector<8x384xf32>, vector<8x384xf32> -> vector<8x384xf32>
    %36 = arith.addf %31, %35 : vector<8x384xf32>
    %c6 = arith.constant 6 : index
    %c0_32 = arith.constant 0 : index
    %c0_33 = arith.constant 0 : index
    %37 = vector.load %arg3[%c6, %c0_32, %c0_33] : memref<9x8x8xf32, #tpu.memory_space<vmem>>, vector<1x8x8xf32>
    %38 = vector.shape_cast %37 : vector<1x8x8xf32> to vector<8x8xf32>
    %c0_34 = arith.constant 0 : index
    %c145 = arith.constant 145 : index
    %39 = vector.load %arg12[%c0_34, %c145] : memref<32x640xf32, #tpu.memory_space<vmem>>, vector<8x384xf32>
    %cst_35 = arith.constant dense<0.000000e+00> : vector<8x384xf32>
    %40 = tpu.matmul %38, %39, %cst_35 {dimension_numbers = #tpu.dot_dimension_numbers<[1], [0], [0], [1], [0, 0, 1, 1], [], []>} : vector<8x8xf32>, vector<8x384xf32>, vector<8x384xf32> -> vector<8x384xf32>
    %41 = arith.addf %36, %40 : vector<8x384xf32>
    %c7 = arith.constant 7 : index
    %c0_36 = arith.constant 0 : index
    %c0_37 = arith.constant 0 : index
    %42 = vector.load %arg3[%c7, %c0_36, %c0_37] : memref<9x8x8xf32, #tpu.memory_space<vmem>>, vector<1x8x8xf32>
    %43 = vector.shape_cast %42 : vector<1x8x8xf32> to vector<8x8xf32>
    %c0_38 = arith.constant 0 : index
    %c146 = arith.constant 146 : index
    %44 = vector.load %arg12[%c0_38, %c146] : memref<32x640xf32, #tpu.memory_space<vmem>>, vector<8x384xf32>
    %cst_39 = arith.constant dense<0.000000e+00> : vector<8x384xf32>
    %45 = tpu.matmul %43, %44, %cst_39 {dimension_numbers = #tpu.dot_dimension_numbers<[1], [0], [0], [1], [0, 0, 1, 1], [], []>} : vector<8x8xf32>, vector<8x384xf32>, vector<8x384xf32> -> vector<8x384xf32>
    %46 = arith.addf %41, %45 : vector<8x384xf32>
    %c8 = arith.constant 8 : index
    %c0_40 = arith.constant 0 : index
    %c0_41 = arith.constant 0 : index
    %47 = vector.load %arg3[%c8, %c0_40, %c0_41] : memref<9x8x8xf32, #tpu.memory_space<vmem>>, vector<1x8x8xf32>
    %48 = vector.shape_cast %47 : vector<1x8x8xf32> to vector<8x8xf32>
    %c0_42 = arith.constant 0 : index
    %c147 = arith.constant 147 : index
    %49 = vector.load %arg12[%c0_42, %c147] : memref<32x640xf32, #tpu.memory_space<vmem>>, vector<8x384xf32>
    %cst_43 = arith.constant dense<0.000000e+00> : vector<8x384xf32>
    %50 = tpu.matmul %48, %49, %cst_43 {dimension_numbers = #tpu.dot_dimension_numbers<[1], [0], [0], [1], [0, 0, 1, 1], [], []>} : vector<8x8xf32>, vector<8x384xf32>, vector<8x384xf32> -> vector<8x384xf32>
    %51 = arith.addf %46, %50 : vector<8x384xf32>
    %c0_44 = arith.constant 0 : index
    %c0_45 = arith.constant 0 : index
    %52 = vector.load %arg4[%c0_44, %c0_45] : memref<8x1xf32, #tpu.memory_space<vmem>>, vector<8x1xf32>
    %53 = vector.broadcast %52 : vector<8x1xf32> to vector<8x384xf32>
    %54 = arith.addf %51, %53 : vector<8x384xf32>
    %cst_46 = arith.constant 0.000000e+00 : f32
    %55 = vector.broadcast %cst_46 : f32 to vector<8x384xf32>
    %56 = arith.maximumf %54, %55 : vector<8x384xf32>
    %cst_47 = arith.constant 0.000000e+00 : f32
    %57 = vector.shape_cast %2 : vector<1x384xi1> to vector<1x384xi1>
    %58 = vector.broadcast %57 : vector<1x384xi1> to vector<8x384xi1>
    %59 = vector.broadcast %cst_47 : f32 to vector<8x384xf32>
    %60 = arith.select %58, %56, %59 : vector<8x384xi1>, vector<8x384xf32>
    %c8_48 = arith.constant 8 : index
    %c128_49 = arith.constant 128 : index
    %61 = vector.load %arg12[%c8_48, %c128_49] : memref<32x640xf32, #tpu.memory_space<vmem>>, vector<8x384xf32>
    tpu.vector_store %arg12[%c8_48, %c128_49], %60 {strides = array<i32>} : memref<32x640xf32, #tpu.memory_space<vmem>>, vector<8x384xf32>,
    %cst_50 = arith.constant 0.000000e+00 : f32
    %62 = vector.broadcast %cst_50 : f32 to vector<8x384xf32>
    %c0_51 = arith.constant 0 : index
    %c0_52 = arith.constant 0 : index
    %c0_53 = arith.constant 0 : index
    %63 = vector.load %arg5[%c0_51, %c0_52, %c0_53] : memref<9x8x16xf32, #tpu.memory_space<vmem>>, vector<1x8x16xf32>
    %64 = vector.shape_cast %63 : vector<1x8x16xf32> to vector<8x16xf32>
    %c0_54 = arith.constant 0 : index
    %c109_55 = arith.constant 109 : index
    %65 = vector.load %arg12[%c0_54, %c109_55] : memref<32x640xf32, #tpu.memory_space<vmem>>, vector<16x384xf32>
    %cst_56 = arith.constant dense<0.000000e+00> : vector<8x384xf32>
    %66 = tpu.matmul %64, %65, %cst_56 {dimension_numbers = #tpu.dot_dimension_numbers<[1], [0], [0], [1], [0, 0, 1, 1], [], []>} : vector<8x16xf32>, vector<16x384xf32>, vector<8x384xf32> -> vector<8x384xf32>
    %67 = arith.addf %62, %66 : vector<8x384xf32>
    %c1_57 = arith.constant 1 : index
    %c0_58 = arith.constant 0 : index
    %c0_59 = arith.constant 0 : index
    %68 = vector.load %arg5[%c1_57, %c0_58, %c0_59] : memref<9x8x16xf32, #tpu.memory_space<vmem>>, vector<1x8x16xf32>
    %69 = vector.shape_cast %68 : vector<1x8x16xf32> to vector<8x16xf32>
    %c0_60 = arith.constant 0 : index
    %c110_61 = arith.constant 110 : index
    %70 = vector.load %arg12[%c0_60, %c110_61] : memref<32x640xf32, #tpu.memory_space<vmem>>, vector<16x384xf32>
    %cst_62 = arith.constant dense<0.000000e+00> : vector<8x384xf32>
    %71 = tpu.matmul %69, %70, %cst_62 {dimension_numbers = #tpu.dot_dimension_numbers<[1], [0], [0], [1], [0, 0, 1, 1], [], []>} : vector<8x16xf32>, vector<16x384xf32>, vector<8x384xf32> -> vector<8x384xf32>
    %72 = arith.addf %67, %71 : vector<8x384xf32>
    %c2_63 = arith.constant 2 : index
    %c0_64 = arith.constant 0 : index
    %c0_65 = arith.constant 0 : index
    %73 = vector.load %arg5[%c2_63, %c0_64, %c0_65] : memref<9x8x16xf32, #tpu.memory_space<vmem>>, vector<1x8x16xf32>
    %74 = vector.shape_cast %73 : vector<1x8x16xf32> to vector<8x16xf32>
    %c0_66 = arith.constant 0 : index
    %c111_67 = arith.constant 111 : index
    %75 = vector.load %arg12[%c0_66, %c111_67] : memref<32x640xf32, #tpu.memory_space<vmem>>, vector<16x384xf32>
    %cst_68 = arith.constant dense<0.000000e+00> : vector<8x384xf32>
    %76 = tpu.matmul %74, %75, %cst_68 {dimension_numbers = #tpu.dot_dimension_numbers<[1], [0], [0], [1], [0, 0, 1, 1], [], []>} : vector<8x16xf32>, vector<16x384xf32>, vector<8x384xf32> -> vector<8x384xf32>
    %77 = arith.addf %72, %76 : vector<8x384xf32>
    %c3_69 = arith.constant 3 : index
    %c0_70 = arith.constant 0 : index
    %c0_71 = arith.constant 0 : index
    %78 = vector.load %arg5[%c3_69, %c0_70, %c0_71] : memref<9x8x16xf32, #tpu.memory_space<vmem>>, vector<1x8x16xf32>
    %79 = vector.shape_cast %78 : vector<1x8x16xf32> to vector<8x16xf32>
    %c0_72 = arith.constant 0 : index
    %c127_73 = arith.constant 127 : index
    %80 = vector.load %arg12[%c0_72, %c127_73] : memref<32x640xf32, #tpu.memory_space<vmem>>, vector<16x384xf32>
    %cst_74 = arith.constant dense<0.000000e+00> : vector<8x384xf32>
    %81 = tpu.matmul %79, %80, %cst_74 {dimension_numbers = #tpu.dot_dimension_numbers<[1], [0], [0], [1], [0, 0, 1, 1], [], []>} : vector<8x16xf32>, vector<16x384xf32>, vector<8x384xf32> -> vector<8x384xf32>
    %82 = arith.addf %77, %81 : vector<8x384xf32>
    %c4_75 = arith.constant 4 : index
    %c0_76 = arith.constant 0 : index
    %c0_77 = arith.constant 0 : index
    %83 = vector.load %arg5[%c4_75, %c0_76, %c0_77] : memref<9x8x16xf32, #tpu.memory_space<vmem>>, vector<1x8x16xf32>
    %84 = vector.shape_cast %83 : vector<1x8x16xf32> to vector<8x16xf32>
    %c0_78 = arith.constant 0 : index
    %c128_79 = arith.constant 128 : index
    %85 = vector.load %arg12[%c0_78, %c128_79] : memref<32x640xf32, #tpu.memory_space<vmem>>, vector<16x384xf32>
    %cst_80 = arith.constant dense<0.000000e+00> : vector<8x384xf32>
    %86 = tpu.matmul %84, %85, %cst_80 {dimension_numbers = #tpu.dot_dimension_numbers<[1], [0], [0], [1], [0, 0, 1, 1], [], []>} : vector<8x16xf32>, vector<16x384xf32>, vector<8x384xf32> -> vector<8x384xf32>
    %87 = arith.addf %82, %86 : vector<8x384xf32>
    %c5_81 = arith.constant 5 : index
    %c0_82 = arith.constant 0 : index
    %c0_83 = arith.constant 0 : index
    %88 = vector.load %arg5[%c5_81, %c0_82, %c0_83] : memref<9x8x16xf32, #tpu.memory_space<vmem>>, vector<1x8x16xf32>
    %89 = vector.shape_cast %88 : vector<1x8x16xf32> to vector<8x16xf32>
    %c0_84 = arith.constant 0 : index
    %c129_85 = arith.constant 129 : index
    %90 = vector.load %arg12[%c0_84, %c129_85] : memref<32x640xf32, #tpu.memory_space<vmem>>, vector<16x384xf32>
    %cst_86 = arith.constant dense<0.000000e+00> : vector<8x384xf32>
    %91 = tpu.matmul %89, %90, %cst_86 {dimension_numbers = #tpu.dot_dimension_numbers<[1], [0], [0], [1], [0, 0, 1, 1], [], []>} : vector<8x16xf32>, vector<16x384xf32>, vector<8x384xf32> -> vector<8x384xf32>
    %92 = arith.addf %87, %91 : vector<8x384xf32>
    %c6_87 = arith.constant 6 : index
    %c0_88 = arith.constant 0 : index
    %c0_89 = arith.constant 0 : index
    %93 = vector.load %arg5[%c6_87, %c0_88, %c0_89] : memref<9x8x16xf32, #tpu.memory_space<vmem>>, vector<1x8x16xf32>
    %94 = vector.shape_cast %93 : vector<1x8x16xf32> to vector<8x16xf32>
    %c0_90 = arith.constant 0 : index
    %c145_91 = arith.constant 145 : index
    %95 = vector.load %arg12[%c0_90, %c145_91] : memref<32x640xf32, #tpu.memory_space<vmem>>, vector<16x384xf32>
    %cst_92 = arith.constant dense<0.000000e+00> : vector<8x384xf32>
    %96 = tpu.matmul %94, %95, %cst_92 {dimension_numbers = #tpu.dot_dimension_numbers<[1], [0], [0], [1], [0, 0, 1, 1], [], []>} : vector<8x16xf32>, vector<16x384xf32>, vector<8x384xf32> -> vector<8x384xf32>
    %97 = arith.addf %92, %96 : vector<8x384xf32>
    %c7_93 = arith.constant 7 : index
    %c0_94 = arith.constant 0 : index
    %c0_95 = arith.constant 0 : index
    %98 = vector.load %arg5[%c7_93, %c0_94, %c0_95] : memref<9x8x16xf32, #tpu.memory_space<vmem>>, vector<1x8x16xf32>
    %99 = vector.shape_cast %98 : vector<1x8x16xf32> to vector<8x16xf32>
    %c0_96 = arith.constant 0 : index
    %c146_97 = arith.constant 146 : index
    %100 = vector.load %arg12[%c0_96, %c146_97] : memref<32x640xf32, #tpu.memory_space<vmem>>, vector<16x384xf32>
    %cst_98 = arith.constant dense<0.000000e+00> : vector<8x384xf32>
    %101 = tpu.matmul %99, %100, %cst_98 {dimension_numbers = #tpu.dot_dimension_numbers<[1], [0], [0], [1], [0, 0, 1, 1], [], []>} : vector<8x16xf32>, vector<16x384xf32>, vector<8x384xf32> -> vector<8x384xf32>
    %102 = arith.addf %97, %101 : vector<8x384xf32>
    %c8_99 = arith.constant 8 : index
    %c0_100 = arith.constant 0 : index
    %c0_101 = arith.constant 0 : index
    %103 = vector.load %arg5[%c8_99, %c0_100, %c0_101] : memref<9x8x16xf32, #tpu.memory_space<vmem>>, vector<1x8x16xf32>
    %104 = vector.shape_cast %103 : vector<1x8x16xf32> to vector<8x16xf32>
    %c0_102 = arith.constant 0 : index
    %c147_103 = arith.constant 147 : index
    %105 = vector.load %arg12[%c0_102, %c147_103] : memref<32x640xf32, #tpu.memory_space<vmem>>, vector<16x384xf32>
    %cst_104 = arith.constant dense<0.000000e+00> : vector<8x384xf32>
    %106 = tpu.matmul %104, %105, %cst_104 {dimension_numbers = #tpu.dot_dimension_numbers<[1], [0], [0], [1], [0, 0, 1, 1], [], []>} : vector<8x16xf32>, vector<16x384xf32>, vector<8x384xf32> -> vector<8x384xf32>
    %107 = arith.addf %102, %106 : vector<8x384xf32>
    %c0_105 = arith.constant 0 : index
    %c0_106 = arith.constant 0 : index
    %108 = vector.load %arg6[%c0_105, %c0_106] : memref<8x1xf32, #tpu.memory_space<vmem>>, vector<8x1xf32>
    %109 = vector.broadcast %108 : vector<8x1xf32> to vector<8x384xf32>
    %110 = arith.addf %107, %109 : vector<8x384xf32>
    %cst_107 = arith.constant 0.000000e+00 : f32
    %111 = vector.broadcast %cst_107 : f32 to vector<8x384xf32>
    %112 = arith.maximumf %110, %111 : vector<8x384xf32>
    %cst_108 = arith.constant 0.000000e+00 : f32
    %113 = vector.shape_cast %2 : vector<1x384xi1> to vector<1x384xi1>
    %114 = vector.broadcast %113 : vector<1x384xi1> to vector<8x384xi1>
    %115 = vector.broadcast %cst_108 : f32 to vector<8x384xf32>
    %116 = arith.select %114, %112, %115 : vector<8x384xi1>, vector<8x384xf32>
    %c16 = arith.constant 16 : index
    %c128_109 = arith.constant 128 : index
    %117 = vector.load %arg12[%c16, %c128_109] : memref<32x640xf32, #tpu.memory_space<vmem>>, vector<8x384xf32>
    tpu.vector_store %arg12[%c16, %c128_109], %116 {strides = array<i32>} : memref<32x640xf32, #tpu.memory_space<vmem>>, vector<8x384xf32>,
    %cst_110 = arith.constant 0.000000e+00 : f32
    %118 = vector.broadcast %cst_110 : f32 to vector<8x384xf32>
    %c0_111 = arith.constant 0 : index
    %c0_112 = arith.constant 0 : index
    %c0_113 = arith.constant 0 : index
    %119 = vector.load %arg7[%c0_111, %c0_112, %c0_113] : memref<9x8x24xf32, #tpu.memory_space<vmem>>, vector<1x8x24xf32>
    %120 = vector.shape_cast %119 : vector<1x8x24xf32> to vector<8x24xf32>
    %c0_114 = arith.constant 0 : index
    %c109_115 = arith.constant 109 : index
    %121 = vector.load %arg12[%c0_114, %c109_115] : memref<32x640xf32, #tpu.memory_space<vmem>>, vector<24x384xf32>
    %cst_116 = arith.constant dense<0.000000e+00> : vector<8x384xf32>
    %122 = tpu.matmul %120, %121, %cst_116 {dimension_numbers = #tpu.dot_dimension_numbers<[1], [0], [0], [1], [0, 0, 1, 1], [], []>} : vector<8x24xf32>, vector<24x384xf32>, vector<8x384xf32> -> vector<8x384xf32>
    %123 = arith.addf %118, %122 : vector<8x384xf32>
    %c1_117 = arith.constant 1 : index
    %c0_118 = arith.constant 0 : index
    %c0_119 = arith.constant 0 : index
    %124 = vector.load %arg7[%c1_117, %c0_118, %c0_119] : memref<9x8x24xf32, #tpu.memory_space<vmem>>, vector<1x8x24xf32>
    %125 = vector.shape_cast %124 : vector<1x8x24xf32> to vector<8x24xf32>
    %c0_120 = arith.constant 0 : index
    %c110_121 = arith.constant 110 : index
    %126 = vector.load %arg12[%c0_120, %c110_121] : memref<32x640xf32, #tpu.memory_space<vmem>>, vector<24x384xf32>
    %cst_122 = arith.constant dense<0.000000e+00> : vector<8x384xf32>
    %127 = tpu.matmul %125, %126, %cst_122 {dimension_numbers = #tpu.dot_dimension_numbers<[1], [0], [0], [1], [0, 0, 1, 1], [], []>} : vector<8x24xf32>, vector<24x384xf32>, vector<8x384xf32> -> vector<8x384xf32>
    %128 = arith.addf %123, %127 : vector<8x384xf32>
    %c2_123 = arith.constant 2 : index
    %c0_124 = arith.constant 0 : index
    %c0_125 = arith.constant 0 : index
    %129 = vector.load %arg7[%c2_123, %c0_124, %c0_125] : memref<9x8x24xf32, #tpu.memory_space<vmem>>, vector<1x8x24xf32>
    %130 = vector.shape_cast %129 : vector<1x8x24xf32> to vector<8x24xf32>
    %c0_126 = arith.constant 0 : index
    %c111_127 = arith.constant 111 : index
    %131 = vector.load %arg12[%c0_126, %c111_127] : memref<32x640xf32, #tpu.memory_space<vmem>>, vector<24x384xf32>
    %cst_128 = arith.constant dense<0.000000e+00> : vector<8x384xf32>
    %132 = tpu.matmul %130, %131, %cst_128 {dimension_numbers = #tpu.dot_dimension_numbers<[1], [0], [0], [1], [0, 0, 1, 1], [], []>} : vector<8x24xf32>, vector<24x384xf32>, vector<8x384xf32> -> vector<8x384xf32>
    %133 = arith.addf %128, %132 : vector<8x384xf32>
    %c3_129 = arith.constant 3 : index
    %c0_130 = arith.constant 0 : index
    %c0_131 = arith.constant 0 : index
    %134 = vector.load %arg7[%c3_129, %c0_130, %c0_131] : memref<9x8x24xf32, #tpu.memory_space<vmem>>, vector<1x8x24xf32>
    %135 = vector.shape_cast %134 : vector<1x8x24xf32> to vector<8x24xf32>
    %c0_132 = arith.constant 0 : index
    %c127_133 = arith.constant 127 : index
    %136 = vector.load %arg12[%c0_132, %c127_133] : memref<32x640xf32, #tpu.memory_space<vmem>>, vector<24x384xf32>
    %cst_134 = arith.constant dense<0.000000e+00> : vector<8x384xf32>
    %137 = tpu.matmul %135, %136, %cst_134 {dimension_numbers = #tpu.dot_dimension_numbers<[1], [0], [0], [1], [0, 0, 1, 1], [], []>} : vector<8x24xf32>, vector<24x384xf32>, vector<8x384xf32> -> vector<8x384xf32>
    %138 = arith.addf %133, %137 : vector<8x384xf32>
    %c4_135 = arith.constant 4 : index
    %c0_136 = arith.constant 0 : index
    %c0_137 = arith.constant 0 : index
    %139 = vector.load %arg7[%c4_135, %c0_136, %c0_137] : memref<9x8x24xf32, #tpu.memory_space<vmem>>, vector<1x8x24xf32>
    %140 = vector.shape_cast %139 : vector<1x8x24xf32> to vector<8x24xf32>
    %c0_138 = arith.constant 0 : index
    %c128_139 = arith.constant 128 : index
    %141 = vector.load %arg12[%c0_138, %c128_139] : memref<32x640xf32, #tpu.memory_space<vmem>>, vector<24x384xf32>
    %cst_140 = arith.constant dense<0.000000e+00> : vector<8x384xf32>
    %142 = tpu.matmul %140, %141, %cst_140 {dimension_numbers = #tpu.dot_dimension_numbers<[1], [0], [0], [1], [0, 0, 1, 1], [], []>} : vector<8x24xf32>, vector<24x384xf32>, vector<8x384xf32> -> vector<8x384xf32>
    %143 = arith.addf %138, %142 : vector<8x384xf32>
    %c5_141 = arith.constant 5 : index
    %c0_142 = arith.constant 0 : index
    %c0_143 = arith.constant 0 : index
    %144 = vector.load %arg7[%c5_141, %c0_142, %c0_143] : memref<9x8x24xf32, #tpu.memory_space<vmem>>, vector<1x8x24xf32>
    %145 = vector.shape_cast %144 : vector<1x8x24xf32> to vector<8x24xf32>
    %c0_144 = arith.constant 0 : index
    %c129_145 = arith.constant 129 : index
    %146 = vector.load %arg12[%c0_144, %c129_145] : memref<32x640xf32, #tpu.memory_space<vmem>>, vector<24x384xf32>
    %cst_146 = arith.constant dense<0.000000e+00> : vector<8x384xf32>
    %147 = tpu.matmul %145, %146, %cst_146 {dimension_numbers = #tpu.dot_dimension_numbers<[1], [0], [0], [1], [0, 0, 1, 1], [], []>} : vector<8x24xf32>, vector<24x384xf32>, vector<8x384xf32> -> vector<8x384xf32>
    %148 = arith.addf %143, %147 : vector<8x384xf32>
    %c6_147 = arith.constant 6 : index
    %c0_148 = arith.constant 0 : index
    %c0_149 = arith.constant 0 : index
    %149 = vector.load %arg7[%c6_147, %c0_148, %c0_149] : memref<9x8x24xf32, #tpu.memory_space<vmem>>, vector<1x8x24xf32>
    %150 = vector.shape_cast %149 : vector<1x8x24xf32> to vector<8x24xf32>
    %c0_150 = arith.constant 0 : index
    %c145_151 = arith.constant 145 : index
    %151 = vector.load %arg12[%c0_150, %c145_151] : memref<32x640xf32, #tpu.memory_space<vmem>>, vector<24x384xf32>
    %cst_152 = arith.constant dense<0.000000e+00> : vector<8x384xf32>
    %152 = tpu.matmul %150, %151, %cst_152 {dimension_numbers = #tpu.dot_dimension_numbers<[1], [0], [0], [1], [0, 0, 1, 1], [], []>} : vector<8x24xf32>, vector<24x384xf32>, vector<8x384xf32> -> vector<8x384xf32>
    %153 = arith.addf %148, %152 : vector<8x384xf32>
    %c7_153 = arith.constant 7 : index
    %c0_154 = arith.constant 0 : index
    %c0_155 = arith.constant 0 : index
    %154 = vector.load %arg7[%c7_153, %c0_154, %c0_155] : memref<9x8x24xf32, #tpu.memory_space<vmem>>, vector<1x8x24xf32>
    %155 = vector.shape_cast %154 : vector<1x8x24xf32> to vector<8x24xf32>
    %c0_156 = arith.constant 0 : index
    %c146_157 = arith.constant 146 : index
    %156 = vector.load %arg12[%c0_156, %c146_157] : memref<32x640xf32, #tpu.memory_space<vmem>>, vector<24x384xf32>
    %cst_158 = arith.constant dense<0.000000e+00> : vector<8x384xf32>
    %157 = tpu.matmul %155, %156, %cst_158 {dimension_numbers = #tpu.dot_dimension_numbers<[1], [0], [0], [1], [0, 0, 1, 1], [], []>} : vector<8x24xf32>, vector<24x384xf32>, vector<8x384xf32> -> vector<8x384xf32>
    %158 = arith.addf %153, %157 : vector<8x384xf32>
    %c8_159 = arith.constant 8 : index
    %c0_160 = arith.constant 0 : index
    %c0_161 = arith.constant 0 : index
    %159 = vector.load %arg7[%c8_159, %c0_160, %c0_161] : memref<9x8x24xf32, #tpu.memory_space<vmem>>, vector<1x8x24xf32>
    %160 = vector.shape_cast %159 : vector<1x8x24xf32> to vector<8x24xf32>
    %c0_162 = arith.constant 0 : index
    %c147_163 = arith.constant 147 : index
    %161 = vector.load %arg12[%c0_162, %c147_163] : memref<32x640xf32, #tpu.memory_space<vmem>>, vector<24x384xf32>
    %cst_164 = arith.constant dense<0.000000e+00> : vector<8x384xf32>
    %162 = tpu.matmul %160, %161, %cst_164 {dimension_numbers = #tpu.dot_dimension_numbers<[1], [0], [0], [1], [0, 0, 1, 1], [], []>} : vector<8x24xf32>, vector<24x384xf32>, vector<8x384xf32> -> vector<8x384xf32>
    %163 = arith.addf %158, %162 : vector<8x384xf32>
    %c0_165 = arith.constant 0 : index
    %c0_166 = arith.constant 0 : index
    %164 = vector.load %arg8[%c0_165, %c0_166] : memref<8x1xf32, #tpu.memory_space<vmem>>, vector<8x1xf32>
    %165 = vector.broadcast %164 : vector<8x1xf32> to vector<8x384xf32>
    %166 = arith.addf %163, %165 : vector<8x384xf32>
    %cst_167 = arith.constant 0.000000e+00 : f32
    %167 = vector.broadcast %cst_167 : f32 to vector<8x384xf32>
    %168 = arith.maximumf %166, %167 : vector<8x384xf32>
    %cst_168 = arith.constant 0.000000e+00 : f32
    %169 = vector.shape_cast %2 : vector<1x384xi1> to vector<1x384xi1>
    %170 = vector.broadcast %169 : vector<1x384xi1> to vector<8x384xi1>
    %171 = vector.broadcast %cst_168 : f32 to vector<8x384xf32>
    %172 = arith.select %170, %168, %171 : vector<8x384xi1>, vector<8x384xf32>
    %c24 = arith.constant 24 : index
    %c128_169 = arith.constant 128 : index
    %173 = vector.load %arg12[%c24, %c128_169] : memref<32x640xf32, #tpu.memory_space<vmem>>, vector<8x384xf32>
    tpu.vector_store %arg12[%c24, %c128_169], %172 {strides = array<i32>} : memref<32x640xf32, #tpu.memory_space<vmem>>, vector<8x384xf32>,
    %c0_170 = arith.constant 0 : index
    %c128_171 = arith.constant 128 : index
    %174 = vector.load %arg12[%c0_170, %c128_171] : memref<32x640xf32, #tpu.memory_space<vmem>>, vector<32x384xf32>
    %c0_172 = arith.constant 0 : index
    %c0_173 = arith.constant 0 : index
    %175 = vector.load %arg9[%c0_172, %c0_173] : memref<8x32xf32, #tpu.memory_space<vmem>>, vector<8x32xf32>
    %cst_174 = arith.constant dense<0.000000e+00> : vector<8x384xf32>
    %176 = tpu.matmul %175, %174, %cst_174 {dimension_numbers = #tpu.dot_dimension_numbers<[1], [0], [0], [1], [0, 0, 1, 1], [], []>} : vector<8x32xf32>, vector<32x384xf32>, vector<8x384xf32> -> vector<8x384xf32>
    %c0_175 = arith.constant 0 : index
    %c0_176 = arith.constant 0 : index
    %177 = vector.load %arg10[%c0_175, %c0_176] : memref<8x1xf32, #tpu.memory_space<vmem>>, vector<8x1xf32>
    %178 = vector.broadcast %177 : vector<8x1xf32> to vector<8x384xf32>
    %179 = arith.addf %176, %178 : vector<8x384xf32>
    %c0_177 = arith.constant 0 : index
    %c128_178 = arith.constant 128 : index
    %180 = vector.load %arg12[%c0_177, %c128_178] : memref<32x640xf32, #tpu.memory_space<vmem>>, vector<8x384xf32>
    %181 = arith.addf %179, %180 : vector<8x384xf32>
    %c0_179 = arith.constant 0 : index
    %c0_180 = arith.constant 0 : index
    %c0_181 = arith.constant 0 : index
    %182 = vector.load %arg11[%c0_179, %c0_180, %c0_181] : memref<1x8x384xf32, #tpu.memory_space<vmem>>, vector<1x8x384xf32>
    %183 = vector.shape_cast %182 : vector<1x8x384xf32> to vector<8x384xf32>
    %184 = vector.shape_cast %181 : vector<8x384xf32> to vector<1x8x384xf32>
    tpu.vector_store %arg11[%c0_179, %c0_180, %c0_181], %184 {strides = array<i32>} : memref<1x8x384xf32, #tpu.memory_space<vmem>>, vector<1x8x384xf32>,
    return
  }
  func.func @transform_0(%arg0: i32) -> (i32, i32, i32) {
    %c0_i32 = arith.constant 0 : i32
    %c0_i32_0 = arith.constant 0 : i32
    %c0_i32_1 = arith.constant 0 : i32
    return %arg0, %c0_i32, %c0_i32_0 : i32, i32, i32
  }
  func.func @transform_1(%arg0: i32) -> (i32, i32) {
    %c0_i32 = arith.constant 0 : i32
    %c0_i32_0 = arith.constant 0 : i32
    %c0_i32_1 = arith.constant 0 : i32
    return %c0_i32, %c0_i32_0 : i32, i32
  }
  func.func @transform_2(%arg0: i32) -> (i32, i32, i32) {
    %c0_i32 = arith.constant 0 : i32
    %c0_i32_0 = arith.constant 0 : i32
    %c0_i32_1 = arith.constant 0 : i32
    %c0_i32_2 = arith.constant 0 : i32
    return %c0_i32, %c0_i32_0, %c0_i32_1 : i32, i32, i32
  }
  func.func @transform_3(%arg0: i32) -> (i32, i32) {
    %c0_i32 = arith.constant 0 : i32
    %c0_i32_0 = arith.constant 0 : i32
    %c0_i32_1 = arith.constant 0 : i32
    return %c0_i32, %c0_i32_0 : i32, i32
  }
  func.func @transform_4(%arg0: i32) -> (i32, i32, i32) {
    %c0_i32 = arith.constant 0 : i32
    %c0_i32_0 = arith.constant 0 : i32
    %c0_i32_1 = arith.constant 0 : i32
    %c0_i32_2 = arith.constant 0 : i32
    return %c0_i32, %c0_i32_0, %c0_i32_1 : i32, i32, i32
  }
  func.func @transform_5(%arg0: i32) -> (i32, i32) {
    %c0_i32 = arith.constant 0 : i32
    %c0_i32_0 = arith.constant 0 : i32
    %c0_i32_1 = arith.constant 0 : i32
    return %c0_i32, %c0_i32_0 : i32, i32
  }
  func.func @transform_6(%arg0: i32) -> (i32, i32, i32) {
    %c0_i32 = arith.constant 0 : i32
    %c0_i32_0 = arith.constant 0 : i32
    %c0_i32_1 = arith.constant 0 : i32
    %c0_i32_2 = arith.constant 0 : i32
    return %c0_i32, %c0_i32_0, %c0_i32_1 : i32, i32, i32
  }
  func.func @transform_7(%arg0: i32) -> (i32, i32) {
    %c0_i32 = arith.constant 0 : i32
    %c0_i32_0 = arith.constant 0 : i32
    %c0_i32_1 = arith.constant 0 : i32
    return %c0_i32, %c0_i32_0 : i32, i32
  }
  func.func @transform_8(%arg0: i32) -> (i32, i32) {
    %c0_i32 = arith.constant 0 : i32
    %c0_i32_0 = arith.constant 0 : i32
    %c0_i32_1 = arith.constant 0 : i32
    return %c0_i32, %c0_i32_0 : i32, i32
  }
  func.func @transform_9(%arg0: i32) -> (i32, i32) {
    %c0_i32 = arith.constant 0 : i32
    %c0_i32_0 = arith.constant 0 : i32
    %c0_i32_1 = arith.constant 0 : i32
    return %c0_i32, %c0_i32_0 : i32, i32
  }
  func.func @transform_10(%arg0: i32) -> (i32, i32, i32) {
    %c0_i32 = arith.constant 0 : i32
    %c0_i32_0 = arith.constant 0 : i32
    %c0_i32_1 = arith.constant 0 : i32
    return %arg0, %c0_i32, %c0_i32_0 : i32, i32, i32
  }
}

</mosaic_0001>

<bundles_post_ra>
// kernel: tpu_custom_call.1
= control target key start
LH: loop header
LB: loop body
LE: loop exit
PB: predicated region body
PF: predicated region fallthrough
CT: control target
= control target key end

     0   :  { %15 = vsyncpa [#allocation4], 0  ;;  %s7596_s0 = inlined_call_operand.hbm [shape: f32[2,8,384], index: 0, kind: input, shape index: {}]   ;;  %s7597_s1 = inlined_call_operand.vmem [shape: f32[1,384], index: 1, kind: input, shape index: {}]   ;;  %s7598_s2 = inlined_call_operand.vmem [shape: f32[9,8,8], index: 2, kind: input, shape index: {}]   ;;  %s7599_s3 = inlined_call_operand.vmem [shape: f32[8,1], index: 3, kind: input, shape index: {}]   ;;  %s7600_s4 = inlined_call_operand.vmem [shape: f32[9,8,16], index: 4, kind: input, shape index: {}]   ;;  %s7601_s5 = inlined_call_operand.vmem [shape: f32[8,1], index: 5, kind: input, shape index: {}]   ;;  %s7602_s6 = inlined_call_operand.vmem [shape: f32[9,8,24], index: 6, kind: input, shape index: {}]   ;;  %s7603_s7 = inlined_call_operand.vmem [shape: f32[8,1], index: 7, kind: input, shape index: {}]   ;;  %s7604_s8 = inlined_call_operand.vmem [shape: f32[8,32], index: 8, kind: input, shape index: {}]   ;;  %s7605_s9 = inlined_call_operand.vmem [shape: f32[8,1], index: 9, kind: input, shape index: {}]   ;;  %s7606_s10 = inlined_call_operand.hbm [shape: f32[2,8,384], index: 10, kind: output, shape index: {}]  }
   0x1   :  { %17 = vsyncpa [#allocation4 + $0x1], 0 }
   0x2   :  { %18 = vsyncpa [#allocation5], 0 }
   0x3   :  { %20 = vsyncpa [#allocation5 + $0x1], 0  ;;  %s6112_s13 = smov 0   ;;  %s6114_s14 = smov 0  }
   0x4   :  { %s6116_s15 = smov 0   ;;  %s6118_s16 = smov 0  }
   0x5 LB: > { %7628 = sst [smem:[#allocation9_spill]] %s6038_s15  ;;  %s6133_s17 = sadd.s32 4294967295, %s6042_s16   ;;  %s6042_s16 = sphi %s6118_s16, %s7693_s16   ;;  %s6038_s15 = sphi %s6116_s15, %s7695_s15   ;;  %s6034_s14 = sphi %s6114_s14, %s7697_s14   ;;  %s6030_s13 = sphi %s6112_s13, %s7696_s13  }
   0x6   : > { %s5493_s18 = sadd.s32 4294967294, %s6042_s16   ;;  %s6137_s19 = sadd.s32 1, %s6042_s16  }
   0x7   : > { %7629 = sst [smem:[#allocation10_spill]] %s6137_s19  ;;  %s33_s20 = sadd.s32 1, %s6038_s15 }
   0x8   : > { %s30_s21 = ssub.s32 %s6042_s16, %s6137_s19  ;;  %p40_p0 = scmp.ne.s32.totalorder %s6038_s15, %s6034_s14 }
   0x9   : > { %p31_p1 = scmp.eq.s32.totalorder %s30_s21, 0  ;;  %p41_p2 = scmp.eq.s32.totalorder %s6042_s16, 0 }
   0xa   : > { %p46_p3 = scmp.ne.s32.totalorder %s6034_s14, %s6030_s13  ;;  %p47_p4 = scmp.eq.s32.totalorder %s6133_s17, 0 }
   0xb   : > { %s6149_s22 = scalar_select %p31_p1, %s6038_s15, %s33_s20  }
   0xc   : > { %p42_p5 = por %p41_p2, %p40_p0  ;;  %p6151_p6 = por %p47_p4, %p46_p3 }
   0xd   : > { %7630 = sst [smem:[#allocation11_spill]] %s6149_s22  ;;  %p259_p7 = scmp.eq.s32.totalorder %s6133_s17, 1 }
   0xe   : > { %s7631_s23 = scalar_select %p6151_p6, 1, 0 }
   0xf   : > { %p265_p8 = scmp.eq.s32.totalorder %s5493_s18, 1  ;;  %p5883_p10 = scmp.lt.s32.totalorder %s6042_s16, 2 }
  0x10   : > { %p6158_p11 = por %p259_p7, %p40_p0  ;;  %s312_s26 = sand.u32 1, %s6038_s15  }
  0x11   : > { %p6162_p12 = por %p265_p8, %p46_p3  ;;  %s5868_s27 = smul.u32 384, %s6042_s16 }
  0x12   : > { %s7632_s24 = scalar_select %p6158_p11, 1, 0 }
  0x13   : > { %s7633_s25 = scalar_select %p6162_p12, 1, 0 }
  0x14   : > { %s5867_s28 = smul.u32 24, %s312_s26  ;;  %s6171_s11 = scalar_lea.hbm %s7596_s0, %s5868_s27 }
  0x15   : > { %7634 = sst [smem:[#allocation12_spill]] %s7633_s25  ;;  %p6173_p13 = pnand %p5883_p10, %p42_p5 }
  0x16   : > { %s316_s18 = scalar_lea.vmem [#allocation3], %s5867_s28  ;;  %s313_s21 = scalar_lea.sflag [#allocation4], %s312_s26 }
  0x17   : > { %s324_s20 = sshll.u32 %s316_s18, 4  ;;  %s5950_s22 = scalar_lea.hbm %s6171_s11, 384  ;;  %s325_s20 = int_to_ptr.vmem [resolvable:$true] %s324_s20 }
  0x18   : > { %p5951_p2 = scmp.ne.s32.totalorder %s6171_s11, %s5950_s22  ;;  %p5952_p3 = pneg %p6173_p13 }
  0x19   : > { %s5955_s30 = scalar_lea.hbm %s7596_s0, 768  ;;  %p5956_p5 = scmp.lt.s32.totalorder %s6171_s11, %s7596_s0 }
  0x1a   : > { %p5953_p4 = pnand %p5952_p3, %p5951_p2  ;;  %p5957_p8 = scmp.lt.s32.totalorder %s5955_s30, %s5950_s22 }
  0x1c   : > { %p5954_p7 = pneg %p5953_p4  ;;  %p5958_p10 = por %p5957_p8, %p5956_p5 }
  0x1e   : > { %p5959_p9 = pnand %p5958_p10, %p5954_p7 }
  0x20   : > { %5962 = shalt.err (!%p5959_p9)
}
  0x21   : > { %s5963_s28 = scalar_lea.vmem %s325_s20, 384  ;;  %s6044_s26 = smov [#allocation3]  }
  0x22   : > { %p5964_p0 = scmp.ne.s32.totalorder %s325_s20, %s5963_s28  ;;  %s5968_s18 = sshll.u32 %s6044_s26, 4  ;;  %s5969_s18 = int_to_ptr.vmem [resolvable:$false] %s5968_s18 }
  0x23   : > { %s5970_s25 = scalar_lea.vmem %s5969_s18, 768  ;;  %p5971_p2 = scmp.lt.s32.totalorder %s325_s20, %s5969_s18 }
  0x24   : > { %p5966_p1 = pnand %p5964_p0, %p5952_p3  ;;  %p5972_p4 = scmp.lt.s32.totalorder %s5970_s25, %s5963_s28 }
  0x26   : > { %p5967_p12 = pneg %p5966_p1  ;;  %p5973_p11 = por %p5972_p4, %p5971_p2 }
  0x28   : > { %p5974_p6 = pnand %p5973_p11, %p5967_p12 }
  0x2a   : > { %5977 = shalt.err (!%p5974_p6)
}
  0x2b   : > { %5878 = dma.hbm_to_vmem [thread:$0]  (!%p6173_p13), %s6171_s11, 384, %s325_s20, %s313_s21  }
  0x2c   : > { %p7636_p9 = scmp.lt.s32.totalorder %s6042_s16, 3  ;;  %p7637_p7 = scmp.ge.s32.totalorder %s6042_s16, 1 }
  0x2e   : > { %p330_p5 = pnand %p7637_p7, %p7636_p9 }
  0x30   : > { %333 = sbr.rel (%p330_p5) target bundleno = 1477 (0x5c5), region = 60 }
  0x35   : > { %s6198_s15 = sand.u32 1, %s6034_s14   ;;  %p7638_p6 = scmp.ne.s32.totalorder %s7631_s23, 0 }
  0x36   : > { %s5869_s19 = smul.u32 24, %s6198_s15  ;;  %s336_s22 = scalar_lea.sflag [#allocation4], %s6198_s15 }
  0x38   : > { %s339_s25 = scalar_lea.vmem [#allocation3], %s5869_s19 }
  0x39   : > { %6021 = dma.done.wait (%p7638_p6), %s336_s22, 384  }
  0x3a   : > { %6023 = vsyncadd (%p7638_p6), %s336_s22, 4294966912  ;;  %v6208_v0 = vld [vmem:[#allocation2 + $0x60] sm:$0xff]  ;;  %s6045_s11 = smov 18   ;;  %s6046_s12 = smov 17   ;;  %v6220_v3 = vld [vmem:[%s339_s25 + $0x10] sm:$0xff]  ;;  %v7614_v4 = vmov 0.0  }
  0x3b   : > { %v6210_v1 = vld [vmem:[%s339_s25] sm:$0xff]  ;;  %v6212_v2 = vld [vmem:[%s339_s25 + $0x8] sm:$0xff]  ;;  %395 = vrot.lane.b32.xlu1 %v6208_v0, %s6045_s11  ;;  %716 = vrot.lane.b32.xlu0 %v6208_v0, %s6046_s12  ;;  %383 = vst [vmem:[#allocation2 + $0x80] sm:$0xff] %v6220_v3  ;;  %s6048_s23 = smov 19   ;;  %vm6049_vm0 = vmmov 0   ;;  %s6050_s20 = smov 1  }
  0x3c   : > { %381 = vst [vmem:[#allocation2 + $0x8] sm:$0xff] %v6210_v1  ;;  %382 = vst [vmem:[#allocation2 + $0x40] sm:$0xff] %v6212_v2  ;;  %5667 = vmatprep.subr.mxu1 %v7614_v4  ;;  %478 = vmatprep.mubr.f32.mxu0 %v7614_v4  ;;  %s6051_s21 = smov 127   ;;  %s6052_s27 = smov 111   ;;  %v6271_v5 = vld [vmem:[#allocation2 + $0x20] sm:$0xff]  ;;  %v6055_v6 = vmov 0  }
  0x3d   : > { %5669 = vmatprep.mubr.msk.f32.mxu1 %vm6049_vm0, %v7614_v4  ;;  %s6053_s29 = smov 110   ;;  %s6054_s30 = smov 109   ;;  %5928 = vset.pattern.permute.xlu0 %v6055_v6  ;;  %v1855_v7 = vld [vmem:[%s7599_s3] sm:$0xff]  ;;  %v6296_v8 = vld [vmem:[#allocation2 + $0x90] sm:$0xff]  ;;  %vm403_vm1 = vcmask 146432   ;;  %v5498_v16 = vld [vmem:[%s7598_s2 + $0x8] sm:$0xff] }
  0x3e   : > { %5929 = vset.pattern.permute.xlu1 %v6055_v6  ;;  %vm410_vm2 = vcmask 64512   ;;  %vm563_vm3 = vcmask 154624   ;;  %v384_v21 = vld [vmem:[%s7598_s2] sm:$0xff]  ;;  %vm724_vm4 = vcmask 138240   ;;  %v5503_v28 = vld [vmem:[%s7598_s2 + $0x10] sm:$0xff]  ;;  %vm888_vm5 = vcmask 7168  }
  0x3f   : > { %555 = vrot.lane.b32.xlu1 %v6208_v0, %s6048_s23  ;;  %397 = vrot.lane.b32.xlu0 %v6210_v1, %s6045_s11  ;;  %v5506_v36 = vld [vmem:[%s7598_s2 + $0x18] sm:$0xff]  ;;  %v5509_v40 = vld [vmem:[%s7598_s2 + $0x20] sm:$0xff]  ;;  %vm1209_vm6 = vcmask 1039360   ;;  %vm1373_vm7 = vcmask 908288   ;;  %vm1537_vm8 = vcmask 900096   ;;  %vm1701_vm9 = vcmask 891904  }
  0x40   : > { %v5512_v45 = vld [vmem:[%s7598_s2 + $0x28] sm:$0xff]  ;;  %v5515_v53 = vld [vmem:[%s7598_s2 + $0x30] sm:$0xff]  ;;  %v5518_v61 = vld [vmem:[%s7598_s2 + $0x38] sm:$0xff]  ;;  %vm1936_vm14 = vcmask 130048   ;;  %vm3567_vm15 = vcmask 195584   ;;  %s5870_s28 = smul.u32 384, %s6133_s17 }
  0x41   : > { %s375_s26 = scalar_lea.vmem [#allocation6], %s5869_s19  ;;  %p7689_p12 = scmp.ne.s32.totalorder %s7632_s24, 0 }
  0x42   : > { %s6056_s17 = smov [#allocation6]  }
  0x43   : > { %557 = vrot.lane.b32.xlu1 %v6210_v1, %s6048_s23  ;;  %399 = vrot.lane.b32.xlu0 %v6212_v2, %s6045_s11  ;;  %s5982_s19 = sshll.u32 %s6056_s17, 4  ;;  %s5983_s19 = int_to_ptr.vmem [resolvable:$false] %s5982_s19 }
  0x47   : > { %720 = vrot.lane.b32.xlu1 %v6212_v2, %s6046_s12  ;;  %559 = vrot.lane.b32.xlu0 %v6212_v2, %s6048_s23 }
  0x4b   : > { %401 = vrot.lane.b32.xlu1 %v6220_v3, %s6045_s11  ;;  %718 = vrot.lane.b32.xlu0 %v6210_v1, %s6046_s12 }
  0x4f   : > { %884 = vrot.lane.b32.xlu1 %v6212_v2, %s6050_s20  ;;  %882 = vrot.lane.b32.xlu0 %v6210_v1, %s6050_s20 }
  0x53   : > { %561 = vrot.lane.b32.xlu1 %v6220_v3, %s6048_s23  ;;  %880 = vrot.lane.b32.xlu0 %v6208_v0, %s6050_s20 }
  0x57   : > { %1203 = vrot.lane.b32.xlu1 %v6212_v2, %s6051_s21  ;;  %722 = vrot.lane.b32.xlu0 %v6220_v3, %s6046_s12 }
  0x5b   : > { %1201 = vrot.lane.b32.xlu1 %v6210_v1, %s6051_s21  ;;  %1205 = vrot.lane.b32.xlu0 %v6220_v3, %s6051_s21 }
  0x5f   : > { %1367 = vrot.lane.b32.xlu1 %v6212_v2, %s6052_s27  ;;  %886 = vrot.lane.b32.xlu0 %v6220_v3, %s6050_s20 }
  0x63   : > { %1365 = vrot.lane.b32.xlu1 %v6210_v1, %s6052_s27  ;;  %1369 = vrot.lane.b32.xlu0 %v6220_v3, %s6052_s27 }
  0x67   : > { %1533 = vrot.lane.b32.xlu1 %v6220_v3, %s6053_s29  ;;  %1531 = vrot.lane.b32.xlu0 %v6212_v2, %s6053_s29 }
  0x6b   : > { %1207 = vrot.lane.b32.xlu1 %v6271_v5, %s6051_s21  ;;  %1529 = vrot.lane.b32.xlu0 %v6210_v1, %s6053_s29 }
  0x6f   : > { %1697 = vrot.lane.b32.xlu1 %v6220_v3, %s6054_s30  ;;  %1695 = vrot.lane.b32.xlu0 %v6212_v2, %s6054_s30 }
  0x73   : > { %1371 = vrot.lane.b32.xlu1 %v6271_v5, %s6052_s27  ;;  %1693 = vrot.lane.b32.xlu0 %v6210_v1, %s6054_s30 }
  0x77   : > { %1699 = vrot.lane.b32.xlu1 %v6271_v5, %s6054_s30  ;;  %1535 = vrot.lane.b32.xlu0 %v6271_v5, %s6053_s29 }
  0x7b   : > { %1858 = vperm.xlu0 %5928, %v1855_v7   ;;  %1910 = vrot.lane.b32.xlu1 %v6210_v1, %s6045_s11 }
  0x7f   : > { %1908 = vrot.lane.b32.xlu1 %v6208_v0, %s6045_s11  ;;  %1916 = vrot.lane.b32.xlu0 %v6296_v8, %s6045_s11 }
  0x83   : > { %2083 = vrot.lane.b32.xlu1 %v6210_v1, %s6048_s23  ;;  %1912 = vrot.lane.b32.xlu0 %v6212_v2, %s6045_s11 }
  0x87   : > { %2081 = vrot.lane.b32.xlu1 %v6208_v0, %s6048_s23  ;;  %2089 = vrot.lane.b32.xlu0 %v6296_v8, %s6048_s23 }
  0x8b   : > { %2263 = vrot.lane.b32.xlu1 %v6296_v8, %s6046_s12  ;;  %2085 = vrot.lane.b32.xlu0 %v6212_v2, %s6048_s23 }
  0x8f   : > { %2259 = vrot.lane.b32.xlu1 %v6212_v2, %s6046_s12  ;;  %2257 = vrot.lane.b32.xlu0 %v6210_v1, %s6046_s12 }
  0x93   : > { %2255 = vrot.lane.b32.xlu1 %v6208_v0, %s6046_s12  ;;  %1914 = vrot.lane.b32.xlu0 %v6220_v3, %s6045_s11 }
  0x97   : > { %2440 = vrot.lane.b32.xlu1 %v6296_v8, %s6050_s20  ;;  %2434 = vrot.lane.b32.xlu0 %v6210_v1, %s6050_s20 }
  0x9b   : > { %2436 = vrot.lane.b32.xlu1 %v6212_v2, %s6050_s20  ;;  %2087 = vrot.lane.b32.xlu0 %v6220_v3, %s6048_s23 }
  0x9f   : > { %2432 = vrot.lane.b32.xlu1 %v6208_v0, %s6050_s20  ;;  %2776 = vrot.lane.b32.xlu0 %v6212_v2, %s6051_s21 }
  0xa3   : > { %2261 = vrot.lane.b32.xlu1 %v6220_v3, %s6046_s12  ;;  %2438 = vrot.lane.b32.xlu0 %v6220_v3, %s6050_s20 }
  0xa7   : > { %2778 = vrot.lane.b32.xlu1 %v6220_v3, %s6051_s21  ;;  %2955 = vrot.lane.b32.xlu0 %v6220_v3, %s6052_s27 }
  0xab   : > { %2774 = vrot.lane.b32.xlu1 %v6210_v1, %s6051_s21 }
  0xad   : > { %v396_v9 = vpop.permute.xlu1 %395  ;;  %v717_v10 = vpop.permute.xlu0 %716 }
  0xaf   : > { %2953 = vrot.lane.b32.xlu1 %v6212_v2, %s6052_s27 }
  0xb1   : > { %v556_v11 = vpop.permute.xlu1 %555  ;;  %v398_v12 = vpop.permute.xlu0 %397 }
  0xb2   : > { %v404_v17 = vsel %vm403_vm1, %v396_v9, %v398_v12 }
  0xb3   : > { %2951 = vrot.lane.b32.xlu1 %v6210_v1, %s6052_s27 }
  0xb5   : > { %v558_v13 = vpop.permute.xlu1 %557  ;;  %v400_v14 = vpop.permute.xlu0 %399 }
  0xb6   : > { %v405_v15 = vsel %vm403_vm1, %v398_v12, %v400_v14  ;;  %v564_v22 = vsel %vm563_vm3, %v556_v11, %v558_v13 }
  0xb7   : > { %444 = vmatprep.subr.mxu0 %v405_v15 }
  0xb8   : > { %445 = vmatpush1.msra.mxu0 %v404_v17 }
  0xb9   : > { %v721_v18 = vpop.permute.xlu1 %720  ;;  %v560_v19 = vpop.permute.xlu0 %559  ;;  %5499 = vmatmul.mubr.msk.f32.vlgmr.msra.gmra.mxu0 %vm410_vm2, %v5498_v16 }
  0xba   : > { %v565_v20 = vsel %vm563_vm3, %v558_v13, %v560_v19  ;;  %637 = vmatprep.mubr.f32.mxu0 %v7614_v4  ;;  %v5521_v13 = vld [vmem:[%s7598_s2 + $0x40] sm:$0xff] }
  0xbb   : > { %603 = vmatprep.subr.mxu0 %v565_v20 }
  0xbc   : > { %604 = vmatpush1.msra.mxu0 %v564_v22 }
  0xbd   : > { %v402_v23 = vpop.permute.xlu1 %401  ;;  %v719_v24 = vpop.permute.xlu0 %718  ;;  %5501 = vmatmul.mubr.msk.f32.vlgmr.msra.gmra.mxu0 %vm410_vm2, %v384_v21 }
  0xbe   : > { %v406_v25 = vsel %vm403_vm1, %v400_v14, %v402_v23  ;;  %v726_v26 = vsel %vm724_vm4, %v719_v24, %v721_v18  ;;  %v725_v27 = vsel %vm724_vm4, %v717_v10, %v719_v24  ;;  %798 = vmatprep.mubr.f32.mxu0 %v7614_v4 }
  0xbf   : > { %5668 = vmatpush3.msra.mxu1 %v406_v25  ;;  %764 = vmatprep.subr.mxu0 %v726_v26 }
  0xc0   : > { %765 = vmatpush1.msra.mxu0 %v725_v27  ;;  %5672 = vmatprep.subr.mxu1 %v7614_v4 }
  0xc1   : > { %v885_v29 = vpop.permute.xlu1 %884  ;;  %v883_v30 = vpop.permute.xlu0 %882  ;;  %5670 = vmatmul.mubr.msk.f32.vlgmr.msra.gmra.mxu1 %vm410_vm2, %v5498_v16  ;;  %5504 = vmatmul.mubr.msk.f32.vlgmr.msra.gmra.mxu0 %vm410_vm2, %v5503_v28 }
  0xc2   : > { %v890_v31 = vsel %vm888_vm5, %v883_v30, %v885_v29  ;;  %5674 = vmatprep.mubr.msk.f32.mxu1 %vm6049_vm0, %v7614_v4  ;;  %962 = vmatprep.mubr.f32.mxu0 %v7614_v4 }
  0xc3   : > { %928 = vmatprep.subr.mxu0 %v890_v31 }
  0xc5   : > { %v562_v32 = vpop.permute.xlu1 %561  ;;  %v881_v33 = vpop.permute.xlu0 %880 }
  0xc6   : > { %v566_v34 = vsel %vm563_vm3, %v560_v19, %v562_v32  ;;  %v889_v35 = vsel %vm888_vm5, %v881_v33, %v883_v30 }
  0xc7   : > { %5673 = vmatpush3.msra.mxu1 %v566_v34  ;;  %929 = vmatpush1.msra.mxu0 %v889_v35 }
  0xc8   : > { %5677 = vmatprep.subr.mxu1 %v7614_v4  ;;  %5675 = vmatmul.mubr.msk.f32.vlgmr.msra.gmra.mxu1 %vm410_vm2, %v384_v21 }
  0xc9   : > { %v1204_v37 = vpop.permute.xlu1 %1203  ;;  %v723_v38 = vpop.permute.xlu0 %722  ;;  %5507 = vmatmul.mubr.msk.f32.vlgmr.msra.gmra.mxu0 %vm410_vm2, %v5506_v36  ;;  %1077 = vmatprep.subr.mxu0 %v6212_v2 }
  0xca   : > { %v727_v39 = vsel %vm724_vm4, %v721_v18, %v723_v38  ;;  %1078 = vmatpush1.msra.mxu0 %v6210_v1  ;;  %5679 = vmatprep.mubr.msk.f32.mxu1 %vm6049_vm0, %v7614_v4  ;;  %v6456_v18 = vld [vmem:[#allocation2 + $0x28] sm:$0xff] }
  0xcb   : > { %5678 = vmatpush3.msra.mxu1 %v727_v39  ;;  %1111 = vmatprep.mubr.f32.mxu0 %v7614_v4 }
  0xcc   : > { %5680 = vmatmul.mubr.msk.f32.vlgmr.msra.gmra.mxu1 %vm410_vm2, %v5503_v28  ;;  %5682 = vmatprep.subr.mxu1 %v7614_v4 }
  0xcd   : > { %v1202_v41 = vpop.permute.xlu1 %1201  ;;  %v1206_v42 = vpop.permute.xlu0 %1205  ;;  %5510 = vmatmul.mubr.msk.f32.vlgmr.msra.gmra.mxu0 %vm410_vm2, %v5509_v40  ;;  %5684 = vmatprep.mubr.msk.f32.mxu1 %vm6049_vm0, %v7614_v4 }
  0xce   : > { %v1210_v43 = vsel %vm1209_vm6, %v1202_v41, %v1204_v37  ;;  %v1211_v44 = vsel %vm1209_vm6, %v1204_v37, %v1206_v42  ;;  %1283 = vmatprep.mubr.f32.mxu0 %v7614_v4  ;;  %2788 = vrot.lane.b32.xlu0 %v6456_v18, %s6051_s21 }
  0xcf   : > { %1249 = vmatprep.subr.mxu0 %v1211_v44 }
  0xd0   : > { %1250 = vmatpush1.msra.mxu0 %v1210_v43 }
  0xd1   : > { %v1368_v46 = vpop.permute.xlu1 %1367  ;;  %v887_v47 = vpop.permute.xlu0 %886  ;;  %5513 = vmatmul.mubr.msk.f32.vlgmr.msra.gmra.mxu0 %vm410_vm2, %v5512_v45 }
  0xd2   : > { %v891_v48 = vsel %vm888_vm5, %v885_v29, %v887_v47  ;;  %1447 = vmatprep.mubr.f32.mxu0 %v7614_v4  ;;  %3130 = vrot.lane.b32.xlu0 %v6212_v2, %s6053_s29 }
  0xd3   : > { %5683 = vmatpush3.msra.mxu1 %v891_v48 }
  0xd4   : > { %5685 = vmatmul.mubr.msk.f32.vlgmr.msra.gmra.mxu1 %vm410_vm2, %v5506_v36  ;;  %5687 = vmatprep.subr.mxu1 %v7614_v4 }
  0xd5   : > { %v1366_v49 = vpop.permute.xlu1 %1365  ;;  %v1370_v50 = vpop.permute.xlu0 %1369  ;;  %5688 = vmatpush3.msra.mxu1 %v6220_v3  ;;  %5689 = vmatprep.mubr.msk.f32.mxu1 %vm6049_vm0, %v7614_v4 }
  0xd6   : > { %v1374_v51 = vsel %vm1373_vm7, %v1366_v49, %v1368_v46  ;;  %v1375_v52 = vsel %vm1373_vm7, %v1368_v46, %v1370_v50  ;;  %5692 = vmatprep.subr.mxu1 %v7614_v4 }
  0xd7   : > { %1413 = vmatprep.subr.mxu0 %v1375_v52 }
  0xd8   : > { %5690 = vmatmul.mubr.msk.f32.vlgmr.msra.gmra.mxu1 %vm410_vm2, %v5509_v40  ;;  %1414 = vmatpush1.msra.mxu0 %v1374_v51 }
  0xd9   : > { %v1534_v54 = vpop.permute.xlu1 %1533  ;;  %v1532_v55 = vpop.permute.xlu0 %1531  ;;  %5694 = vmatprep.mubr.msk.f32.mxu1 %vm6049_vm0, %v7614_v4  ;;  %5516 = vmatmul.mubr.msk.f32.vlgmr.msra.gmra.mxu0 %vm410_vm2, %v5515_v53 }
  0xda   : > { %v1539_v56 = vsel %vm1537_vm8, %v1532_v55, %v1534_v54  ;;  %1611 = vmatprep.mubr.f32.mxu0 %v7614_v4 }
  0xdb   : > { %1577 = vmatprep.subr.mxu0 %v1539_v56 }
  0xdd   : > { %v1208_v57 = vpop.permute.xlu1 %1207  ;;  %v1530_v58 = vpop.permute.xlu0 %1529 }
  0xde   : > { %v1212_v59 = vsel %vm1209_vm6, %v1206_v42, %v1208_v57  ;;  %v1538_v60 = vsel %vm1537_vm8, %v1530_v58, %v1532_v55 }
  0xdf   : > { %5693 = vmatpush3.msra.mxu1 %v1212_v59  ;;  %1578 = vmatpush1.msra.mxu0 %v1538_v60 }
  0xe0   : > { %5695 = vmatmul.mubr.msk.f32.vlgmr.msra.gmra.mxu1 %vm410_vm2, %v5512_v45  ;;  %5697 = vmatprep.subr.mxu1 %v7614_v4 }
  0xe1   : > { %v1698_v62 = vpop.permute.xlu1 %1697  ;;  %v1696_v63 = vpop.permute.xlu0 %1695  ;;  %5699 = vmatprep.mubr.msk.f32.mxu1 %vm6049_vm0, %v7614_v4  ;;  %5519 = vmatmul.mubr.msk.f32.vlgmr.msra.gmra.mxu0 %vm410_vm2, %v5518_v61 }
  0xe2   : > { %v1703_v7 = vsel %vm1701_vm9, %v1696_v63, %v1698_v62  ;;  %1775 = vmatprep.mubr.f32.mxu0 %v7614_v4 }
  0xe3   : > { %1741 = vmatprep.subr.mxu0 %v1703_v7 }
  0xe5   : > { %v1372_v9 = vpop.permute.xlu1 %1371  ;;  %v1694_v10 = vpop.permute.xlu0 %1693 }
  0xe6   : > { %v1376_v11 = vsel %vm1373_vm7, %v1370_v50, %v1372_v9  ;;  %v1702_v12 = vsel %vm1701_vm9, %v1694_v10, %v1696_v63  ;;  %v1868_v50 = vlaneseq }
  0xe7   : > { %5698 = vmatpush3.msra.mxu1 %v1376_v11  ;;  %1742 = vmatpush1.msra.mxu0 %v1702_v12 }
  0xe8   : > { %5700 = vmatmul.mubr.msk.f32.vlgmr.msra.gmra.mxu1 %vm410_vm2, %v5515_v53  ;;  %5702 = vmatprep.subr.mxu1 %v7614_v4  ;;  %v1869_v57 = vshrl.u32 %v1868_v50, 7 }
  0xe9   : > { %v1700_v14 = vpop.permute.xlu1 %1699  ;;  %v1536_v15 = vpop.permute.xlu0 %1535  ;;  %5704 = vmatprep.mubr.msk.f32.mxu1 %vm6049_vm0, %v7614_v4  ;;  %5522 = vmatmul.mubr.msk.f32.vlgmr.msra.gmra.mxu0 %vm410_vm2, %v5521_v13 }
  0xea   : > { %v1540_v16 = vsel %vm1537_vm8, %v1534_v54, %v1536_v15  ;;  %2004 = vmatprep.mubr.f32.mxu0 %v7614_v4  ;;  %v1704_v17 = vsel %vm1701_vm9, %v1698_v62, %v1700_v14  ;;  %v376_v54 = vld [vmem:[%s7597_s1] sm:$0x7]  ;;  %v1870_v63 = vsub.s32 0, %v1869_v57  ;;  %v1874_v11 = vsub.s32 1, %v1869_v57 }
  0xeb   : > { %5703 = vmatpush3.msra.mxu1 %v1540_v16  ;;  %vm377_vm10 = vcmp.ne.f32.partialorder %v376_v54, 0.0 }
  0xec   : > { %5705 = vmatmul.mubr.msk.f32.vlgmr.msra.gmra.mxu1 %vm410_vm2, %v5518_v61  ;;  %5707 = vmatprep.subr.mxu1 %v7614_v4  ;;  %v1867_v9 = vsel %vm377_vm10, 1, %v6055_v6 }
  0xed   : > { %5708 = vmatpush3.msra.mxu1 %v1704_v17  ;;  %5709 = vmatprep.mubr.msk.f32.mxu1 %vm6049_vm0, %v7614_v4  ;;  %v6466_v15 = vrot.slane %v1867_v9, %v1870_v63 }
  0xee   : > { %5712 = vmatprep.subr.mxu1 %v7614_v4 }
  0xef   : > { %vm1880_vm11 = vcmp.eq.s32.totalorder %v6466_v15, 1 }
  0xf0   : > { %5710 = vmatmul.mubr.msk.f32.vlgmr.msra.gmra.mxu1 %vm410_vm2, %v5521_v13 }
  0xf1   : > { %5716 = vmatprep.mubr.msk.f32.mxu1 %vm6049_vm0, %v7614_v4 }
 0x179   : > { %v480_v19 = vpop.f32.mrf.mxu0 }
 0x17b   : > { %v482_v20 = vpop.f32.mrf.mxu0 }
 0x17d   : > { %v639_v21 = vpop.f32.mrf.mxu0 }
 0x17e   : > { %v640_v33 = vadd.f32 %v639_v21, %v480_v19  ;;  %v1859_v19 = vpop.permute.xlu0 %1858 }
 0x17f   : > { %v641_v22 = vpop.f32.mrf.mxu0 }
 0x180   : > { %v642_v36 = vadd.f32 %v641_v22, %v482_v20  ;;  %v6468_v22 = vrot.slane %v1867_v9, %v1874_v11 }
 0x181   : > { %v551_v23 = vpop.f32.mrf.mxu1  ;;  %v800_v24 = vpop.f32.mrf.mxu0 }
 0x182   : > { %v875_v38 = vadd.f32 %v800_v24, %v640_v33  ;;  %vm1881_vm12 = vcmp.eq.s32.totalorder %v6468_v22, 1  ;;  %v5247_v22 = vld [vmem:[%s7604_s8] sm:$0xff] }
 0x183   : > { %v5671_v25 = vpop.f32.mrf.mxu1  ;;  %v802_v26 = vpop.f32.mrf.mxu0 }
 0x184   : > { %v876_v40 = vadd.f32 %v802_v26, %v642_v36  ;;  %v1878_v25 = vsub.s32 2, %v1869_v57 }
 0x186   : > { %v6477_v33 = vrot.slane %v1867_v9, %v1878_v25 }
 0x188   : > { %v710_v27 = vpop.f32.mrf.mxu1  ;;  %vm1882_vm13 = vcmp.eq.s32.totalorder %v6477_v33, 1 }
 0x189   : > { %v964_v28 = vpop.f32.mrf.mxu0  ;;  %v711_v53 = vadd.f32 %v710_v27, %v551_v23 }
 0x18a   : > { %v5676_v29 = vpop.f32.mrf.mxu1  ;;  %v1039_v43 = vadd.f32 %v964_v28, %v875_v38 }
 0x18b   : > { %v966_v30 = vpop.f32.mrf.mxu0 }
 0x18c   : > { %v871_v31 = vpop.f32.mrf.mxu1  ;;  %v1040_v45 = vadd.f32 %v966_v30, %v876_v40 }
 0x18d   : > { %v1113_v32 = vpop.f32.mrf.mxu0  ;;  %v877_v61 = vadd.f32 %v871_v31, %v711_v53 }
 0x18e   : > { %v5681_v34 = vpop.f32.mrf.mxu1  ;;  %v1188_v48 = vadd.f32 %v1113_v32, %v1039_v43  ;;  %v6541_v43 = vpop.permute.xlu1 %1910 }
 0x18f   : > { %v1115_v35 = vpop.f32.mrf.mxu0 }
 0x190   : > { %v1189_v49 = vadd.f32 %v1115_v35, %v1040_v45  ;;  %v6553_v45 = vpop.permute.xlu0 %1916 }
 0x191   : > { %v1285_v37 = vpop.f32.mrf.mxu0 }
 0x192   : > { %v1360_v52 = vadd.f32 %v1285_v37, %v1188_v48 }
 0x193   : > { %v1287_v41 = vpop.f32.mrf.mxu0 }
 0x194   : > { %v1035_v39 = vpop.f32.mrf.mxu1  ;;  %v1361_v56 = vadd.f32 %v1287_v41, %v1189_v49 }
 0x195   : > { %v1041_v12 = vadd.f32 %v1035_v39, %v877_v61 }
 0x196   : > { %v5686_v42 = vpop.f32.mrf.mxu1 }
 0x198   : > { %v1184_v44 = vpop.f32.mrf.mxu1 }
 0x199   : > { %v1449_v46 = vpop.f32.mrf.mxu0  ;;  %v1190_v16 = vadd.f32 %v1184_v44, %v1041_v12  ;;  %v6547_v44 = vpop.permute.xlu1 %1908 }
 0x19a   : > { %v5691_v47 = vpop.f32.mrf.mxu1  ;;  %v1524_v60 = vadd.f32 %v1449_v46, %v1360_v52 }
 0x19b   : > { %v1451_v51 = vpop.f32.mrf.mxu0  ;;  %v6561_v47 = vpop.permute.xlu0 %1912 }
 0x19c   : > { %v1525_v62 = vadd.f32 %v1451_v51, %v1361_v56  ;;  %v3507_v56 = vld [vmem:[#allocation2 + $0x48] sm:$0xff] }
 0x19d   : > { %v6559_v46 = vpop.permute.xlu1 %2083 }
 0x19f   : > { %v6573_v49 = vpop.permute.xlu0 %2089 }
 0x1a0   : > { %v1356_v55 = vpop.f32.mrf.mxu1 }
 0x1a1   : > { %v1613_v58 = vpop.f32.mrf.mxu0  ;;  %v1362_v23 = vadd.f32 %v1356_v55, %v1190_v16  ;;  %v6567_v48 = vpop.permute.xlu1 %2081  ;;  %v3480_v55 = vld [vmem:[%s7601_s5] sm:$0xff] }
 0x1a2   : > { %v5696_v59 = vpop.f32.mrf.mxu1  ;;  %v1688_v10 = vadd.f32 %v1613_v58, %v1524_v60 }
 0x1a3   : > { %v1615_v7 = vpop.f32.mrf.mxu0  ;;  %v6581_v51 = vpop.permute.xlu0 %2085 }
 0x1a4   : > { %v1689_v14 = vadd.f32 %v1615_v7, %v1525_v62 }
 0x1a5   : > { %v6575_v50 = vpop.permute.xlu1 %2263 }
 0x1a7   : > { %v6589_v53 = vpop.permute.xlu0 %2257 }
 0x1a8   : > { %v1520_v13 = vpop.f32.mrf.mxu1 }
 0x1a9   : > { %v1777_v17 = vpop.f32.mrf.mxu0  ;;  %v1526_v28 = vadd.f32 %v1520_v13, %v1362_v23  ;;  %v6587_v52 = vpop.permute.xlu1 %2259 }
 0x1aa   : > { %v5701_v20 = vpop.f32.mrf.mxu1  ;;  %v1852_v21 = vadd.f32 %v1777_v17, %v1688_v10 }
 0x1ab   : > { %v1779_v24 = vpop.f32.mrf.mxu0  ;;  %v6604_v57 = vpop.permute.xlu0 %1914 }
 0x1ac   : > { %v1684_v26 = vpop.f32.mrf.mxu1  ;;  %v1853_v27 = vadd.f32 %v1779_v24, %v1689_v14  ;;  %v6470_v6 = vadd.f32 %v1859_v19, %v1852_v21 }
 0x1ad   : > { %v1690_v32 = vadd.f32 %v1684_v26, %v1526_v28  ;;  %v6595_v54 = vpop.permute.xlu1 %2255 }
 0x1ae   : > { %v5706_v29 = vpop.f32.mrf.mxu1  ;;  %v6473_v30 = vadd.f32 %v1859_v19, %v1853_v27  ;;  %v7613_v31 = vmax.f32 %v6470_v6, 0.0 }
 0x1af   : > { %v6609_v59 = vpop.permute.xlu0 %2434  ;;  %v6706_v29 = vld [vmem:[#allocation2 + $0x38] sm:$0xff] }
 0x1b0   : > { %v1848_v34 = vpop.f32.mrf.mxu1  ;;  %v1865_v35 = vmax.f32 %v6473_v30, 0.0  ;;  %v6484_v36 = vsel %vm1880_vm11, %v7613_v31, 0.0  ;;  %v6865_v30 = vld [vmem:[#allocation2 + $0x80] sm:$0xff] }
 0x1b1   : > { %v1854_v37 = vadd.f32 %v1848_v34, %v1690_v32  ;;  %1886 = vst [vmem:[#allocation2 + $0x10] sm:$0xff] %v6484_v36  ;;  %v6607_v58 = vpop.permute.xlu1 %2440 }
 0x1b2   : > { %v6491_v38 = vsel %vm1881_vm12, %v1865_v35, 0.0  ;;  %v5711_v39 = vpop.f32.mrf.mxu1 }
 0x1b3   : > { %v6493_v40 = vadd.f32 %v1859_v19, %v1854_v37  ;;  %1887 = vst [vmem:[#allocation2 + $0x70] sm:$0xff] %v6491_v38  ;;  %v6621_v61 = vpop.permute.xlu0 %2087 }
 0x1b5   : > { %v1866_v41 = vmax.f32 %v6493_v40, 0.0  ;;  %v6615_v60 = vpop.permute.xlu1 %2436  ;;  %v6870_v40 = vld [vmem:[#allocation2 + $0x8] sm:$0xff] }
 0x1b6   : > { %7641 = vst [vmem:[#allocation14_spill] sm:$0xff] %v6870_v40 }
 0x1b7   : > { %v6502_v42 = vsel %vm1882_vm13, %v1866_v41, 0.0  ;;  %v6628_v63 = vpop.permute.xlu0 %2776 }
 0x1b8   : > { %1888 = vst [vmem:[#allocation2 + $0x88] sm:$0xff] %v6502_v42  ;;  %2786 = vrot.lane.b32.xlu1 %v6502_v42, %s6051_s21  ;;  %1922 = vrot.lane.b32.xlu0 %v6502_v42, %s6045_s11 }
 0x1b9   : > { %v6626_v62 = vpop.permute.xlu1 %2432 }
 0x1bb   : > { %v6636_v9 = vpop.permute.xlu0 %2438 }
 0x1bc   : > { %2963 = vrot.lane.b32.xlu1 %v6502_v42, %s6052_s27  ;;  %2095 = vrot.lane.b32.xlu0 %v6502_v42, %s6048_s23 }
 0x1bd   : > { %v6634_v7 = vpop.permute.xlu1 %2261 }
 0x1bf   : > { %v6648_v11 = vpop.permute.xlu0 %2955 }
 0x1c0   : > { %3140 = vrot.lane.b32.xlu1 %v6502_v42, %s6053_s29  ;;  %2269 = vrot.lane.b32.xlu0 %v6502_v42, %s6046_s12 }
 0x1c1   : > { %v6642_v10 = vpop.permute.xlu1 %2778 }
 0x1c3   : > { %v6656_v13 = vpop.permute.xlu0 %2788 }
 0x1c4   : > { %2446 = vrot.lane.b32.xlu0 %v6502_v42, %s6050_s20  ;;  %1918 = vrot.lane.b32.xlu1 %v6484_v36, %s6045_s11 }
 0x1c5   : > { %v6654_v12 = vpop.permute.xlu1 %2774 }
 0x1c7   : > { %v6667_v16 = vpop.permute.xlu0 %3130 }
 0x1c8   : > { %2091 = vrot.lane.b32.xlu0 %v6484_v36, %s6048_s23  ;;  %2782 = vrot.lane.b32.xlu1 %v6484_v36, %s6051_s21 }
 0x1c9   : > { %v6661_v14 = vpop.permute.xlu1 %2953 }
 0x1cc   : > { %2265 = vrot.lane.b32.xlu0 %v6484_v36, %s6046_s12  ;;  %3136 = vrot.lane.b32.xlu1 %v6484_v36, %s6053_s29 }
 0x1cd   : > { %v6669_v17 = vpop.permute.xlu1 %2951 }
 0x1d0   : > { %2442 = vrot.lane.b32.xlu0 %v6484_v36, %s6050_s20  ;;  %1920 = vrot.lane.b32.xlu1 %v6491_v38, %s6045_s11 }
 0x1d4   : > { %2959 = vrot.lane.b32.xlu0 %v6484_v36, %s6052_s27  ;;  %2093 = vrot.lane.b32.xlu1 %v6491_v38, %s6048_s23 }
 0x1d8   : > { %2780 = vrot.lane.b32.xlu0 %v6271_v5, %s6051_s21  ;;  %2267 = vrot.lane.b32.xlu1 %v6491_v38, %s6046_s12 }
 0x1dc   : > { %2965 = vrot.lane.b32.xlu0 %v6456_v18, %s6052_s27  ;;  %2444 = vrot.lane.b32.xlu1 %v6491_v38, %s6050_s20 }
 0x1e0   : > { %3307 = vrot.lane.b32.xlu0 %v6212_v2, %s6054_s30  ;;  %3132 = vrot.lane.b32.xlu1 %v6220_v3, %s6053_s29 }
 0x1e4   : > { %2784 = vrot.lane.b32.xlu0 %v6491_v38, %s6051_s21  ;;  %3128 = vrot.lane.b32.xlu1 %v6210_v1, %s6053_s29 }
 0x1e8   : > { %2961 = vrot.lane.b32.xlu0 %v6491_v38, %s6052_s27  ;;  %3317 = vrot.lane.b32.xlu1 %v6502_v42, %s6054_s30 }
 0x1ec   : > { %3138 = vrot.lane.b32.xlu0 %v6491_v38, %s6053_s29  ;;  %3313 = vrot.lane.b32.xlu1 %v6484_v36, %s6054_s30 }
 0x1f0   : > { %3315 = vrot.lane.b32.xlu0 %v6491_v38, %s6054_s30  ;;  %3309 = vrot.lane.b32.xlu1 %v6220_v3, %s6054_s30 }
 0x1f4   : > { %2957 = vrot.lane.b32.xlu0 %v6271_v5, %s6052_s27  ;;  %3305 = vrot.lane.b32.xlu1 %v6210_v1, %s6054_s30 }
 0x1f8   : > { %3142 = vrot.lane.b32.xlu0 %v6456_v18, %s6053_s29  ;;  %3134 = vrot.lane.b32.xlu1 %v6271_v5, %s6053_s29 }
 0x1fc   : > { %3319 = vrot.lane.b32.xlu0 %v6456_v18, %s6054_s30  ;;  %3311 = vrot.lane.b32.xlu1 %v6271_v5, %s6054_s30 }
 0x200   : > { %3483 = vperm.xlu0 %5928, %v3480_v55   ;;  %3541 = vrot.lane.b32.xlu1 %v3507_v56, %s6045_s11 }
 0x204   : > { %3535 = vrot.lane.b32.xlu0 %v6484_v36, %s6045_s11  ;;  %3527 = vrot.lane.b32.xlu1 %v6210_v1, %s6045_s11 }
 0x208   : > { %3533 = vrot.lane.b32.xlu0 %v6296_v8, %s6045_s11  ;;  %3525 = vrot.lane.b32.xlu1 %v6208_v0, %s6045_s11 }
 0x20c   : > { %3529 = vrot.lane.b32.xlu0 %v6212_v2, %s6045_s11  ;;  %3728 = vrot.lane.b32.xlu1 %v3507_v56, %s6048_s23 }
 0x210   : > { %3539 = vrot.lane.b32.xlu0 %v6502_v42, %s6045_s11  ;;  %3722 = vrot.lane.b32.xlu1 %v6484_v36, %s6048_s23 }
 0x214   : > { %3531 = vrot.lane.b32.xlu0 %v6220_v3, %s6045_s11  ;;  %3720 = vrot.lane.b32.xlu1 %v6296_v8, %s6048_s23 }
 0x218   : > { %3716 = vrot.lane.b32.xlu0 %v6212_v2, %s6048_s23  ;;  %3714 = vrot.lane.b32.xlu1 %v6210_v1, %s6048_s23 }
 0x21c   : > { %3726 = vrot.lane.b32.xlu0 %v6502_v42, %s6048_s23  ;;  %3712 = vrot.lane.b32.xlu1 %v6208_v0, %s6048_s23 }
 0x220   : > { %3718 = vrot.lane.b32.xlu0 %v6220_v3, %s6048_s23  ;;  %3916 = vrot.lane.b32.xlu1 %v3507_v56, %s6046_s12 }
 0x224   : > { %3904 = vrot.lane.b32.xlu0 %v6212_v2, %s6046_s12  ;;  %3910 = vrot.lane.b32.xlu1 %v6484_v36, %s6046_s12 }
 0x228   : > { %3914 = vrot.lane.b32.xlu0 %v6502_v42, %s6046_s12  ;;  %3908 = vrot.lane.b32.xlu1 %v6296_v8, %s6046_s12 }
 0x22a   : > { %v6675_v19 = vpop.permute.xlu1 %2786  ;;  %v1923_v20 = vpop.permute.xlu0 %1922 }
 0x22c   : > { %3906 = vrot.lane.b32.xlu0 %v6220_v3, %s6046_s12  ;;  %3902 = vrot.lane.b32.xlu1 %v6210_v1, %s6046_s12 }
 0x22e   : > { %v6681_v21 = vpop.permute.xlu1 %2963  ;;  %v2096_v23 = vpop.permute.xlu0 %2095 }
 0x230   : > { %4095 = vrot.lane.b32.xlu0 %v6212_v2, %s6050_s20  ;;  %3900 = vrot.lane.b32.xlu1 %v6208_v0, %s6046_s12 }
 0x232   : > { %v6687_v24 = vpop.permute.xlu1 %3140  ;;  %v6689_v25 = vpop.permute.xlu0 %2269 }
 0x234   : > { %4097 = vrot.lane.b32.xlu0 %v6220_v3, %s6050_s20  ;;  %4107 = vrot.lane.b32.xlu1 %v3507_v56, %s6050_s20 }
 0x236   : > { %v6694_v26 = vpop.permute.xlu0 %2446  ;;  %v1919_v27 = vpop.permute.xlu1 %1918 }
 0x238   : > { %4463 = vrot.lane.b32.xlu0 %v6484_v36, %s6051_s21  ;;  %4101 = vrot.lane.b32.xlu1 %v6484_v36, %s6050_s20 }
 0x23a   : > { %v2092_v2 = vpop.permute.xlu0 %2091  ;;  %v6700_v28 = vpop.permute.xlu1 %2782 }
 0x23c   : > { %4459 = vrot.lane.b32.xlu0 %v6220_v3, %s6051_s21  ;;  %4099 = vrot.lane.b32.xlu1 %v6296_v8, %s6050_s20  ;;  %v1927_v8 = vsel %vm403_vm1, %v6553_v45, %v1919_v27  ;;  %v5524_v45 = vld [vmem:[%s7600_s4 + $0x8] sm:$0xff] }
 0x23e   : > { %v2266_v32 = vpop.permute.xlu0 %2265  ;;  %v6708_v34 = vpop.permute.xlu1 %3136 }
 0x240   : > { %4477 = vrot.lane.b32.xlu0 %v6706_v29, %s6051_s21  ;;  %4093 = vrot.lane.b32.xlu1 %v6210_v1, %s6050_s20  ;;  %v1926_v1 = vsel %vm403_vm1, %v6561_v47, %v6604_v57 }
 0x242   : > { %v6714_v37 = vpop.permute.xlu0 %2442  ;;  %v1921_v39 = vpop.permute.xlu1 %1920 }
 0x243   : > { %v1928_v55 = vsel %vm403_vm1, %v1919_v27, %v1921_v39  ;;  %v1929_v56 = vsel %vm403_vm1, %v1921_v39, %v1923_v20  ;;  %v2098_v39 = vsel %vm563_vm3, %v6559_v46, %v6581_v51 }
 0x244   : > { %4469 = vrot.lane.b32.xlu0 %v6456_v18, %s6051_s21  ;;  %4091 = vrot.lane.b32.xlu1 %v6208_v0, %s6050_s20  ;;  %v1925_v18 = vsel %vm403_vm1, %v6541_v43, %v6561_v47  ;;  %v1924_v0 = vsel %vm403_vm1, %v6547_v44, %v6541_v43  ;;  %v2100_v47 = vsel %vm563_vm3, %v6573_v49, %v2092_v2  ;;  %v1889_v49 = vld [vmem:[%s7600_s4] sm:$0xff] }
 0x245   : > { %1968 = vmatprep.subr.mxu0 %v1928_v55  ;;  %5713 = vmatpush3.msra.mxu1 %v1929_v56  ;;  %v2097_v55 = vsel %vm563_vm3, %v6567_v48, %v6559_v46  ;;  %v2274_v48 = vsel %vm724_vm4, %v6575_v50, %v2266_v32  ;;  %v2271_v50 = vsel %vm724_vm4, %v6595_v54, %v6589_v53 }
 0x246   : > { %1969 = vmatpush1.msra.mxu0 %v1927_v8  ;;  %5714 = vmatprep.subr.mxu1 %v7614_v4  ;;  %v6728_v31 = vpop.permute.xlu0 %2959  ;;  %v2094_v20 = vpop.permute.xlu1 %2093  ;;  %v2272_v8 = vsel %vm724_vm4, %v6589_v53, %v6587_v52 }
 0x247   : > { %1970 = vmatprep.subr.mxu0 %v1925_v18  ;;  %5715 = vmatpush3.msra.mxu1 %v1926_v1  ;;  %v2101_v57 = vsel %vm563_vm3, %v2092_v2, %v2094_v20  ;;  %v2102_v27 = vsel %vm563_vm3, %v2094_v20, %v2096_v23  ;;  %v2099_v23 = vsel %vm563_vm3, %v6581_v51, %v6621_v61 }
 0x248   : > { %1971 = vmatpush1.msra.mxu0 %v1924_v0  ;;  %5719 = vmatprep.subr.mxu1 %v7614_v4  ;;  %v2449_v18 = vsel %vm888_vm5, %v6609_v59, %v6615_v60 }
 0x249   : > { %4658 = vrot.lane.b32.xlu0 %v6502_v42, %s6052_s27  ;;  %4105 = vrot.lane.b32.xlu1 %v6502_v42, %s6050_s20 }
 0x24a   : > { %5717 = vmatmul.mubr.msk.f32.vlgmr.msra.gmra.mxu1 %vm1936_vm14, %v5524_v45  ;;  %2140 = vmatprep.subr.mxu0 %v2101_v57  ;;  %v6747_v43 = vpop.permute.xlu0 %2780  ;;  %v2268_v44 = vpop.permute.xlu1 %2267 }
 0x24b   : > { %5720 = vmatpush3.msra.mxu1 %v2102_v27  ;;  %5525 = vmatmul.mubr.msk.f32.vlgmr.msra.gmra.mxu0 %vm1936_vm14, %v5524_v45  ;;  %v2275_v61 = vsel %vm724_vm4, %v2266_v32, %v2268_v44  ;;  %v2276_v46 = vsel %vm724_vm4, %v2268_v44, %v6689_v25  ;;  %v2273_v25 = vsel %vm724_vm4, %v6587_v52, %v6634_v7  ;;  %v6796_v32 = vld [vmem:[#allocation2 + $0x40] sm:$0xff]  ;;  %v5529_v7 = vld [vmem:[%s7600_s4 + $0x10] sm:$0xff] }
 0x24c   : > { %2141 = vmatpush1.msra.mxu0 %v2100_v47  ;;  %5721 = vmatprep.subr.mxu1 %v7614_v4  ;;  %v2448_v45 = vsel %vm888_vm5, %v6626_v62, %v6609_v59  ;;  %v7639_v62 = vmax.f32 %v6470_v6, 0.0  ;;  %v5535_v6 = vld [vmem:[%s7600_s4 + $0x20] sm:$0xff]  ;;  %v2795_v44 = vsel %vm1209_vm6, %v6675_v19, %v6656_v13  ;;  %v5538_v13 = vld [vmem:[%s7600_s4 + $0x28] sm:$0xff] }
 0x24d   : > { %2142 = vmatprep.subr.mxu0 %v2098_v39  ;;  %5722 = vmatpush3.msra.mxu1 %v2099_v23  ;;  %v2792_v23 = vsel %vm1209_vm6, %v6642_v10, %v6747_v43  ;;  %v2790_v39 = vsel %vm1209_vm6, %v6654_v12, %v6628_v63 }
 0x24e   : > { %2143 = vmatpush1.msra.mxu0 %v2097_v55  ;;  %5723 = vmatprep.mubr.msk.f32.mxu1 %vm6049_vm0, %v7614_v4  ;;  %v6768_v2 = vpop.permute.xlu0 %2965  ;;  %v2445_v56 = vpop.permute.xlu1 %2444 }
 0x24f   : > { %5726 = vmatprep.subr.mxu1 %v7614_v4  ;;  %4461 = vrot.lane.b32.xlu0 %v6271_v5, %s6051_s21  ;;  %v2452_v1 = vsel %vm888_vm5, %v6714_v37, %v2445_v56  ;;  %v2453_v52 = vsel %vm888_vm5, %v2445_v56, %v6694_v26  ;;  %v2450_v26 = vsel %vm888_vm5, %v6615_v60, %v6636_v9  ;;  %v5532_v9 = vld [vmem:[%s7600_s4 + $0x18] sm:$0xff] }
 0x250   : > { %4467 = vrot.lane.b32.xlu1 %v6502_v42, %s6051_s21  ;;  %2176 = vmatprep.mubr.f32.mxu0 %v7614_v4  ;;  %v2972_v12 = vsel %vm1373_vm7, %v6681_v21, %v6768_v2 }
 0x251   : > { %5724 = vmatmul.mubr.msk.f32.vlgmr.msra.gmra.mxu1 %vm1936_vm14, %v1889_v49  ;;  %2314 = vmatprep.subr.mxu0 %v2275_v61  ;;  %v2967_v61 = vsel %vm1373_vm7, %v6669_v17, %v6661_v14 }
 0x252   : > { %5727 = vmatpush3.msra.mxu1 %v2276_v46  ;;  %5527 = vmatmul.mubr.msk.f32.vlgmr.msra.gmra.mxu0 %vm1936_vm14, %v1889_v49  ;;  %v6782_v51 = vpop.permute.xlu0 %3307  ;;  %v6784_v5 = vpop.permute.xlu1 %3132  ;;  %v2968_v49 = vsel %vm1373_vm7, %v6661_v14, %v6648_v11 }
 0x253   : > { %2315 = vmatpush1.msra.mxu0 %v2274_v48  ;;  %5728 = vmatprep.subr.mxu1 %v7614_v4  ;;  %v3145_v14 = vsel %vm1537_vm8, %v6667_v16, %v6784_v5 }
 0x254   : > { %2316 = vmatprep.subr.mxu0 %v2272_v8  ;;  %5729 = vmatpush3.msra.mxu1 %v2273_v25 }
 0x255   : > { %2317 = vmatpush1.msra.mxu0 %v2271_v50  ;;  %5730 = vmatprep.mubr.msk.f32.mxu1 %vm6049_vm0, %v7614_v4 }
 0x256   : > { %5733 = vmatprep.subr.mxu1 %v7614_v4  ;;  %4650 = vrot.lane.b32.xlu0 %v6220_v3, %s6052_s27  ;;  %v2785_v53 = vpop.permute.xlu0 %2784  ;;  %v6810_v54 = vpop.permute.xlu1 %3128  ;;  %v2451_v3 = vsel %vm888_vm5, %v6607_v58, %v6714_v37  ;;  %v6832_v58 = vld [vmem:[#allocation2 + $0x8] sm:$0xff]  ;;  %v6862_v37 = vld [vmem:[#allocation2 + $0x40] sm:$0xff] }
 0x257   : > { %4457 = vrot.lane.b32.xlu1 %v6796_v32, %s6051_s21  ;;  %2350 = vmatprep.mubr.f32.mxu0 %v7614_v4  ;;  %7640 = vst [vmem:[#allocation13_spill] sm:$0xff] %v6862_v37  ;;  %v2793_v57 = vsel %vm1209_vm6, %v6700_v28, %v2785_v53  ;;  %v2791_v28 = vsel %vm1209_vm6, %v6628_v63, %v6642_v10 }
 0x258   : > { %5731 = vmatmul.mubr.msk.f32.vlgmr.msra.gmra.mxu1 %vm1936_vm14, %v5529_v7  ;;  %2491 = vmatprep.subr.mxu0 %v2452_v1  ;;  %v3144_v48 = vsel %vm1537_vm8, %v6810_v54, %v6667_v16 }
 0x259   : > { %5734 = vmatpush3.msra.mxu1 %v2453_v52  ;;  %5530 = vmatmul.mubr.msk.f32.vlgmr.msra.gmra.mxu0 %vm1936_vm14, %v5529_v7 }
 0x25a   : > { %2492 = vmatpush1.msra.mxu0 %v2451_v3  ;;  %5735 = vmatprep.subr.mxu1 %v7614_v4  ;;  %v2962_v20 = vpop.permute.xlu0 %2961  ;;  %v6827_v0 = vpop.permute.xlu1 %3317 }
 0x25b   : > { %2493 = vmatprep.subr.mxu0 %v2449_v18  ;;  %5736 = vmatpush3.msra.mxu1 %v2450_v26  ;;  %v2970_v10 = vsel %vm1373_vm7, %v6728_v31, %v2962_v20 }
 0x25c   : > { %2494 = vmatpush1.msra.mxu0 %v2448_v45  ;;  %5737 = vmatprep.mubr.msk.f32.mxu1 %vm6049_vm0, %v7614_v4 }
 0x25d   : > { %5740 = vmatprep.subr.mxu1 %v7614_v4  ;;  %4668 = vrot.lane.b32.xlu0 %v6706_v29, %s6052_s27 }
 0x25e   : > { %4455 = vrot.lane.b32.xlu1 %v6832_v58, %s6051_s21  ;;  %2527 = vmatprep.mubr.f32.mxu0 %v7614_v4  ;;  %v6845_v59 = vpop.permute.xlu1 %3313  ;;  %v3139_v60 = vpop.permute.xlu0 %3138 }
 0x25f   : > { %5738 = vmatmul.mubr.msk.f32.vlgmr.msra.gmra.mxu1 %vm1936_vm14, %v5532_v9  ;;  %5938 = vmatprep.subr.msk.mxu0 %vm1881_vm12, %v1865_v35  ;;  %v3148_v31 = vsel %vm1537_vm8, %v3139_v60, %v6687_v24  ;;  %v3147_v2 = vsel %vm1537_vm8, %v6708_v34, %v3139_v60  ;;  %v5544_v34 = vld [vmem:[%s7600_s4 + $0x38] sm:$0xff] }
 0x260   : > { %5939 = vmatpush3.msk.msra.mxu1 %vm1882_vm13, %v1866_v41  ;;  %5533 = vmatmul.mubr.msk.f32.vlgmr.msra.gmra.mxu0 %vm1936_vm14, %v5532_v9  ;;  %v2794_v41 = vsel %vm1209_vm6, %v2785_v53, %v6675_v19  ;;  %v2971_v19 = vsel %vm1373_vm7, %v2962_v20, %v6681_v21  ;;  %v5541_v21 = vld [vmem:[%s7600_s4 + $0x30] sm:$0xff] }
 0x261   : > { %5940 = vmatpush1.msk.msra.mxu0 %vm1880_vm11, %v7639_v62  ;;  %5742 = vmatprep.subr.mxu1 %v7614_v4 }
 0x262   : > { %2642 = vmatprep.subr.mxu0 %v6862_v37  ;;  %5743 = vmatpush3.msra.mxu1 %v6865_v30  ;;  %v6868_v35 = vpop.permute.xlu1 %3309  ;;  %v3316_v27 = vpop.permute.xlu0 %3315 }
 0x263   : > { %2643 = vmatpush1.msra.mxu0 %v6870_v40  ;;  %5744 = vmatprep.mubr.msk.f32.mxu1 %vm6049_vm0, %v7614_v4  ;;  %v3325_v17 = vsel %vm1701_vm9, %v3316_v27, %v6827_v0  ;;  %v3324_v25 = vsel %vm1701_vm9, %v6845_v59, %v3316_v27  ;;  %v3322_v16 = vsel %vm1701_vm9, %v6782_v51, %v6868_v35 }
 0x264   : > { %5747 = vmatprep.subr.mxu1 %v7614_v4  ;;  %3724 = vrot.lane.b32.xlu0 %v6491_v38, %s6048_s23 }
 0x265   : > { %4654 = vrot.lane.b32.xlu1 %v6484_v36, %s6052_s27  ;;  %2676 = vmatprep.mubr.f32.mxu0 %v7614_v4 }
 0x266   : > { %5745 = vmatmul.mubr.msk.f32.vlgmr.msra.gmra.mxu1 %vm1936_vm14, %v5535_v6  ;;  %2833 = vmatprep.subr.mxu0 %v2794_v41  ;;  %v3306_v47 = vpop.permute.xlu1 %3305  ;;  %v2958_v63 = vpop.permute.xlu0 %2957 }
 0x267   : > { %5748 = vmatpush3.msra.mxu1 %v2795_v44  ;;  %5536 = vmatmul.mubr.msk.f32.vlgmr.msra.gmra.mxu0 %vm1936_vm14, %v5535_v6  ;;  %v2969_v8 = vsel %vm1373_vm7, %v6648_v11, %v2958_v63  ;;  %v3321_v7 = vsel %vm1701_vm9, %v3306_v47, %v6782_v51  ;;  %v5547_v11 = vld [vmem:[%s7600_s4 + $0x40] sm:$0xff] }
 0x268   : > { %2834 = vmatpush1.msra.mxu0 %v2793_v57  ;;  %5749 = vmatprep.subr.mxu1 %v7614_v4 }
 0x269   : > { %2835 = vmatprep.subr.mxu0 %v2791_v28  ;;  %5750 = vmatpush3.msra.mxu1 %v2792_v23 }
 0x26a   : > { %2836 = vmatpush1.msra.mxu0 %v2790_v39  ;;  %5751 = vmatprep.mubr.msk.f32.mxu1 %vm6049_vm0, %v7614_v4  ;;  %v6910_v43 = vpop.permute.xlu1 %3134  ;;  %v3143_v56 = vpop.permute.xlu0 %3142 }
 0x26b   : > { %5754 = vmatprep.subr.mxu1 %v7614_v4  ;;  %3912 = vrot.lane.b32.xlu0 %v6491_v38, %s6046_s12  ;;  %v3149_v51 = vsel %vm1537_vm8, %v6687_v24, %v3143_v56  ;;  %v3146_v24 = vsel %vm1537_vm8, %v6784_v5, %v6910_v43 }
 0x26c   : > { %4648 = vrot.lane.b32.xlu1 %v6796_v32, %s6052_s27  ;;  %2869 = vmatprep.mubr.f32.mxu0 %v7614_v4 }
 0x26d   : > { %5752 = vmatmul.mubr.msk.f32.vlgmr.msra.gmra.mxu1 %vm1936_vm14, %v5538_v13  ;;  %3010 = vmatprep.subr.mxu0 %v2971_v19 }
 0x26e   : > { %5755 = vmatpush3.msra.mxu1 %v2972_v12  ;;  %5539 = vmatmul.mubr.msk.f32.vlgmr.msra.gmra.mxu0 %vm1936_vm14, %v5538_v13  ;;  %v6925_v55 = vpop.permute.xlu1 %3311  ;;  %v3320_v1 = vpop.permute.xlu0 %3319 }
 0x26f   : > { %3011 = vmatpush1.msra.mxu0 %v2970_v10  ;;  %4103 = vrot.lane.b32.xlu0 %v6491_v38, %s6050_s20  ;;  %v3326_v54 = vsel %vm1701_vm9, %v6827_v0, %v3320_v1  ;;  %v3323_v5 = vsel %vm1701_vm9, %v6868_v35, %v6925_v55 }
 0x270   : > { %3012 = vmatprep.subr.mxu0 %v2968_v49  ;;  %4646 = vrot.lane.b32.xlu1 %v6832_v58, %s6052_s27 }
 0x271   : > { %3013 = vmatpush1.msra.mxu0 %v2967_v61  ;;  %3046 = vmatprep.mubr.f32.mxu0 %v7614_v4 }
 0x272   : > { %3187 = vmatprep.subr.mxu0 %v3148_v31  ;;  %5542 = vmatmul.mubr.msk.f32.vlgmr.msra.gmra.mxu0 %vm1936_vm14, %v5541_v21  ;;  %v6946_v46 = vpop.permute.xlu1 %3541 }
 0x273   : > { %3188 = vmatpush1.msra.mxu0 %v3147_v2  ;;  %4465 = vrot.lane.b32.xlu0 %v6491_v38, %s6051_s21 }
 0x274   : > { %3189 = vmatprep.subr.mxu0 %v3145_v14  ;;  %3537 = vrot.lane.b32.xlu1 %v6491_v38, %s6045_s11 }
 0x275   : > { %3190 = vmatpush1.msra.mxu0 %v3144_v48  ;;  %3223 = vmatprep.mubr.f32.mxu0 %v7614_v4 }
 0x276   : > { %3364 = vmatprep.subr.mxu0 %v3325_v17  ;;  %5545 = vmatmul.mubr.msk.f32.vlgmr.msra.gmra.mxu0 %vm1936_vm14, %v5544_v34  ;;  %v6969_v50 = vpop.permute.xlu1 %3527 }
 0x277   : > { %3365 = vmatpush1.msra.mxu0 %v3324_v25  ;;  %5756 = vmatprep.subr.mxu1 %v7614_v4 }
 0x278   : > { %3366 = vmatprep.subr.mxu0 %v3322_v16  ;;  %4656 = vrot.lane.b32.xlu1 %v6491_v38, %s6052_s27 }
 0x279   : > { %5757 = vmatpush3.msra.mxu1 %v2969_v8  ;;  %5758 = vmatprep.mubr.msk.f32.mxu1 %vm6049_vm0, %v7614_v4 }
 0x27a   : > { %3367 = vmatpush1.msra.mxu0 %v3321_v7  ;;  %3400 = vmatprep.mubr.f32.mxu0 %v7614_v4  ;;  %v6987_v52 = vpop.permute.xlu1 %3525 }
 0x27b   : > { %5759 = vmatmul.mubr.msk.f32.vlgmr.msra.gmra.mxu1 %vm1936_vm14, %v5541_v21  ;;  %5548 = vmatmul.mubr.msk.f32.vlgmr.msra.gmra.mxu0 %vm1936_vm14, %v5547_v11  ;;  %v6991_v53 = vpop.permute.xlu0 %3483 }
 0x27c   : > { %5761 = vmatprep.subr.mxu1 %v7614_v4  ;;  %5765 = vmatprep.mubr.msk.f32.mxu1 %vm6049_vm0, %v7614_v4 }
 0x27d   : > { %5762 = vmatpush3.msra.mxu1 %v3149_v51  ;;  %3635 = vmatprep.mubr.f32.mxu0 %v7614_v4 }
 0x27e   : > { %5763 = vmatprep.subr.mxu1 %v7614_v4  ;;  %v7003_v3 = vpop.permute.xlu1 %3728 }
 0x27f   : > { %5764 = vmatpush3.msra.mxu1 %v3146_v24  ;;  %v7005_v26 = vpop.permute.xlu0 %3535 }
 0x280   : > { %5766 = vmatmul.mubr.msk.f32.vlgmr.msra.gmra.mxu1 %vm1936_vm14, %v5544_v34  ;;  %5768 = vmatprep.subr.mxu1 %v7614_v4 }
 0x281   : > { %5769 = vmatpush3.msra.mxu1 %v3326_v54  ;;  %5772 = vmatprep.mubr.msk.f32.mxu1 %vm6049_vm0, %v7614_v4 }
 0x282   : > { %5770 = vmatprep.subr.mxu1 %v7614_v4  ;;  %v7015_v18 = vpop.permute.xlu1 %3722 }
 0x283   : > { %5771 = vmatpush3.msra.mxu1 %v3323_v5  ;;  %v7017_v20 = vpop.permute.xlu0 %3533 }
 0x284   : > { %5773 = vmatmul.mubr.msk.f32.vlgmr.msra.gmra.mxu1 %vm1936_vm14, %v5547_v11  ;;  %5775 = vmatprep.subr.mxu1 %v7614_v4 }
 0x285   : > { %5781 = vmatprep.mubr.msk.f32.mxu1 %vm6049_vm0, %v7614_v4 }
 0x286   : > { %v7023_v0 = vpop.permute.xlu1 %3720 }
 0x287   : > { %v7025_v45 = vpop.permute.xlu0 %3529 }
 0x28a   : > { %v7027_v9 = vpop.permute.xlu1 %3714 }
 0x28b   : > { %v7029_v59 = vpop.permute.xlu0 %3539 }
 0x28e   : > { %v7031_v60 = vpop.permute.xlu1 %3712 }
 0x28f   : > { %v7033_v62 = vpop.permute.xlu0 %3531 }
 0x292   : > { %v7035_v35 = vpop.permute.xlu1 %3916 }
 0x293   : > { %v7037_v6 = vpop.permute.xlu0 %3716 }
 0x296   : > { %v7039_v41 = vpop.permute.xlu1 %3910 }
 0x297   : > { %v7041_v57 = vpop.permute.xlu0 %3726 }
 0x29a   : > { %v7043_v27 = vpop.permute.xlu1 %3908 }
 0x29b   : > { %v7045_v44 = vpop.permute.xlu0 %3718 }
 0x29e   : > { %v7047_v47 = vpop.permute.xlu1 %3902 }
 0x29f   : > { %7642 = vst [vmem:[#allocation15_spill] sm:$0xff] %v7047_v47  ;;  %v7049_v23 = vpop.permute.xlu0 %3904 }
 0x2a0   : > { %7643 = vst [vmem:[#allocation16_spill] sm:$0xff] %v7049_v23 }
 0x2a2   : > { %v7051_v28 = vpop.permute.xlu1 %3900 }
 0x2a3   : > { %7644 = vst [vmem:[#allocation17_spill] sm:$0xff] %v7051_v28  ;;  %v7053_v39 = vpop.permute.xlu0 %3914 }
 0x2a6   : > { %v7055_v13 = vpop.permute.xlu1 %4107 }
 0x2a7   : > { %7645 = vst [vmem:[#allocation18_spill] sm:$0xff] %v7055_v13  ;;  %v7057_v19 = vpop.permute.xlu0 %3906 }
 0x2aa   : > { %v7059_v43 = vpop.permute.xlu1 %4101 }
 0x2ab   : > { %7646 = vst [vmem:[#allocation19_spill] sm:$0xff] %v7059_v43  ;;  %v7061_v63 = vpop.permute.xlu0 %4095 }
 0x2ac   : > { %7647 = vst [vmem:[#allocation20_spill] sm:$0xff] %v7061_v63 }
 0x2ae   : > { %v4100_v10 = vpop.permute.xlu1 %4099 }
 0x2af   : > { %v7065_v12 = vsel %vm888_vm5, %v4100_v10, %v7059_v43  ;;  %v7067_v55 = vpop.permute.xlu0 %4097 }
 0x2b0   : > { %7648 = vst [vmem:[#allocation21_spill] sm:$0xff] %v7065_v12  ;;  %7649 = vst [vmem:[#allocation22_spill] sm:$0xff] %v7067_v55 }
 0x2b2   : > { %v7069_v49 = vpop.permute.xlu1 %4093 }
 0x2b3   : > { %7650 = vst [vmem:[#allocation23_spill] sm:$0xff] %v7069_v49  ;;  %v7071_v31 = vpop.permute.xlu0 %4463 }
 0x2b4   : > { %7651 = vst [vmem:[#allocation24_spill] sm:$0xff] %v7071_v31 }
 0x2b6   : > { %v7073_v21 = vpop.permute.xlu1 %4091 }
 0x2b7   : > { %7652 = vst [vmem:[#allocation25_spill] sm:$0xff] %v7073_v21  ;;  %v7075_v61 = vpop.permute.xlu0 %4459 }
 0x2b8   : > { %7653 = vst [vmem:[#allocation26_spill] sm:$0xff] %v7075_v61 }
 0x2bb   : > { %v7077_v2 = vpop.permute.xlu0 %4477  ;;  %v7079_v56 = vpop.permute.xlu1 %4105 }
 0x2bc   : > { %7654 = vst [vmem:[#allocation27_spill] sm:$0xff] %v7077_v2  ;;  %7655 = vst [vmem:[#allocation28_spill] sm:$0xff] %v7079_v56 }
 0x2bf   : > { %v4470_v14 = vpop.permute.xlu0 %4469 }
 0x2c2   : > { %v7081_v17 = vpop.permute.xlu1 %4467 }
 0x2c3   : > { %7656 = vst [vmem:[#allocation29_spill] sm:$0xff] %v7081_v17  ;;  %v7085_v34 = vsel %vm1209_vm6, %v7081_v17, %v4470_v14 }
 0x2c4   : > { %7657 = vst [vmem:[#allocation30_spill] sm:$0xff] %v7085_v34 }
 0x2c9   : > { %v7087_v48 = vpop.permute.xlu1 %4457 }
 0x2ca   : > { %7658 = vst [vmem:[#allocation31_spill] sm:$0xff] %v7087_v48 }
 0x2d0   : > { %v7089_v25 = vpop.permute.xlu1 %4455 }
 0x2d1   : > { %7659 = vst [vmem:[#allocation32_spill] sm:$0xff] %v7089_v25 }
 0x2d7   : > { %v4655_v8 = vpop.permute.xlu1 %4654 }
 0x2de   : > { %v7091_v16 = vpop.permute.xlu1 %4648 }
 0x2df   : > { %7660 = vst [vmem:[#allocation33_spill] sm:$0xff] %v7091_v16 }
 0x2e2   : > { %v7093_v7 = vpop.permute.xlu1 %4646 }
 0x2e3   : > { %7661 = vst [vmem:[#allocation34_spill] sm:$0xff] %v7093_v7 }
 0x2e6   : > { %v7095_v1 = vpop.permute.xlu1 %3537 }
 0x2ea   : > { %v7097_v11 = vpop.permute.xlu1 %4656 }
 0x2eb   : > { %7662 = vst [vmem:[#allocation35_spill] sm:$0xff] %v7097_v11  ;;  %v7101_v51 = vsel %vm1373_vm7, %v4655_v8, %v7097_v11 }
 0x2ec   : > { %7663 = vst [vmem:[#allocation36_spill] sm:$0xff] %v7101_v51 }
 0x30a   : > { %v2077_v24 = vpop.f32.mrf.mxu1 }
 0x30b   : > { %v2006_v54 = vpop.f32.mrf.mxu0 }
 0x30c   : > { %v5718_v5 = vpop.f32.mrf.mxu1 }
 0x30d   : > { %v2008_v10 = vpop.f32.mrf.mxu0 }
 0x311   : > { %v2249_v14 = vpop.f32.mrf.mxu1 }
 0x312   : > { %v2178_v4 = vpop.f32.mrf.mxu0  ;;  %v2250_v13 = vadd.f32 %v2249_v14, %v2077_v24 }
 0x313   : > { %v5725_v25 = vpop.f32.mrf.mxu1  ;;  %v2179_v40 = vadd.f32 %v2178_v4, %v2006_v54 }
 0x314   : > { %v2180_v48 = vpop.f32.mrf.mxu0 }
 0x315   : > { %v2181_v21 = vadd.f32 %v2180_v48, %v2008_v10 }
 0x318   : > { %v2423_v61 = vpop.f32.mrf.mxu1 }
 0x319   : > { %v2352_v16 = vpop.f32.mrf.mxu0  ;;  %v2429_v4 = vadd.f32 %v2423_v61, %v2250_v13 }
 0x31a   : > { %v5732_v34 = vpop.f32.mrf.mxu1  ;;  %v2427_v8 = vadd.f32 %v2352_v16, %v2179_v40 }
 0x31b   : > { %v2354_v7 = vpop.f32.mrf.mxu0 }
 0x31c   : > { %v2428_v49 = vadd.f32 %v2354_v7, %v2181_v21 }
 0x31f   : > { %v2600_v31 = vpop.f32.mrf.mxu1 }
 0x320   : > { %v2529_v17 = vpop.f32.mrf.mxu0  ;;  %v2606_v10 = vadd.f32 %v2600_v31, %v2429_v4 }
 0x321   : > { %v5739_v2 = vpop.f32.mrf.mxu1  ;;  %v2604_v12 = vadd.f32 %v2529_v17, %v2427_v8 }
 0x322   : > { %v2531_v37 = vpop.f32.mrf.mxu0 }
 0x323   : > { %v2605_v55 = vadd.f32 %v2531_v37, %v2428_v49 }
 0x326   : > { %v2749_v51 = vpop.f32.mrf.mxu1 }
 0x327   : > { %v2678_v11 = vpop.f32.mrf.mxu0  ;;  %v2755_v8 = vadd.f32 %v2749_v51, %v2606_v10 }
 0x328   : > { %v5746_v5 = vpop.f32.mrf.mxu1  ;;  %v2753_v43 = vadd.f32 %v2678_v11, %v2604_v12 }
 0x329   : > { %v2680_v63 = vpop.f32.mrf.mxu0 }
 0x32a   : > { %v2754_v28 = vadd.f32 %v2680_v63, %v2605_v55 }
 0x32d   : > { %v2942_v25 = vpop.f32.mrf.mxu1 }
 0x32e   : > { %v2871_v56 = vpop.f32.mrf.mxu0  ;;  %v2948_v55 = vadd.f32 %v2942_v25, %v2755_v8 }
 0x32f   : > { %v5753_v34 = vpop.f32.mrf.mxu1  ;;  %v2946_v23 = vadd.f32 %v2871_v56, %v2753_v43 }
 0x330   : > { %v2873_v47 = vpop.f32.mrf.mxu0 }
 0x331   : > { %v2947_v54 = vadd.f32 %v2873_v47, %v2754_v28 }
 0x332   : > { %v3048_v2 = vpop.f32.mrf.mxu0 }
 0x333   : > { %v3123_v40 = vadd.f32 %v3048_v2, %v2946_v23 }
 0x334   : > { %v3050_v48 = vpop.f32.mrf.mxu0 }
 0x335   : > { %v3124_v21 = vadd.f32 %v3050_v48, %v2947_v54 }
 0x336   : > { %v3225_v16 = vpop.f32.mrf.mxu0 }
 0x337   : > { %v3300_v17 = vadd.f32 %v3225_v16, %v3123_v40  ;;  %v5934_v40 = vld [vmem:[#allocation2 + $0x20] sm:$0xff] }
 0x338   : > { %v3227_v7 = vpop.f32.mrf.mxu0  ;;  %v5217_v16 = vld [vmem:[%s7603_s7] sm:$0xff] }
 0x339   : > { %v3301_v12 = vadd.f32 %v3227_v7, %v3124_v21 }
 0x33b   : > { %v3119_v37 = vpop.f32.mrf.mxu1  ;;  %v3402_v49 = vpop.f32.mrf.mxu0 }
 0x33c   : > { %v3477_v11 = vadd.f32 %v3402_v49, %v3300_v17  ;;  %v3125_v28 = vadd.f32 %v3119_v37, %v2948_v55 }
 0x33d   : > { %v3404_v24 = vpop.f32.mrf.mxu0  ;;  %v5760_v14 = vpop.f32.mrf.mxu1 }
 0x33e   : > { %v3486_v63 = vadd.f32 %v6991_v53, %v3477_v11  ;;  %v3478_v43 = vadd.f32 %v3404_v24, %v3301_v12 }
 0x340   : > { %v7104_v13 = vmax.f32 %v3486_v63, 0.0  ;;  %v3487_v47 = vadd.f32 %v6991_v53, %v3478_v43  ;;  %v3296_v23 = vpop.f32.mrf.mxu1 }
 0x341   : > { %v3302_v51 = vadd.f32 %v3296_v23, %v3125_v28 }
 0x342   : > { %v3492_v31 = vsel %vm1880_vm11, %v7104_v13, 0.0  ;;  %v7110_v61 = vmax.f32 %v3487_v47, 0.0  ;;  %v5767_v56 = vpop.f32.mrf.mxu1 }
 0x343   : > { %3543 = vrot.lane.b32.xlu1 %v3492_v31, %s6045_s11 }
 0x344   : > { %v3493_v5 = vsel %vm1881_vm12, %v7110_v61, 0.0  ;;  %v3473_v25 = vpop.f32.mrf.mxu1 }
 0x345   : > { %v3479_v34 = vadd.f32 %v3473_v25, %v3302_v51 }
 0x346   : > { %v5774_v2 = vpop.f32.mrf.mxu1 }
 0x347   : > { %v3488_v4 = vadd.f32 %v6991_v53, %v3479_v34  ;;  %3730 = vrot.lane.b32.xlu1 %v3492_v31, %s6048_s23  ;;  %v5933_v53 = vld [vmem:[#allocation2 + $0x28] sm:$0xff] }
 0x349   : > { %v7118_v54 = vmax.f32 %v3488_v4, 0.0  ;;  %v3554_v4 = vsel %vm403_vm1, %v7095_v1, %v7029_v59  ;;  %v3550_v59 = vsel %vm403_vm1, %v6969_v50, %v7025_v45 }
 0x34b   : > { %v3494_v48 = vsel %vm1882_vm13, %v7118_v54, 0.0  ;;  %3918 = vrot.lane.b32.xlu1 %v3492_v31, %s6046_s12 }
 0x34c   : > { %3547 = vrot.lane.b32.xlu0 %v3494_v48, %s6045_s11 }
 0x34f   : > { %4109 = vrot.lane.b32.xlu1 %v3492_v31, %s6050_s20 }
 0x350   : > { %3734 = vrot.lane.b32.xlu0 %v3494_v48, %s6048_s23 }
 0x353   : > { %4471 = vrot.lane.b32.xlu1 %v3492_v31, %s6051_s21 }
 0x354   : > { %3922 = vrot.lane.b32.xlu0 %v3494_v48, %s6046_s12 }
 0x357   : > { %4662 = vrot.lane.b32.xlu1 %v3492_v31, %s6052_s27 }
 0x358   : > { %4113 = vrot.lane.b32.xlu0 %v3494_v48, %s6050_s20 }
 0x35b   : > { %4853 = vrot.lane.b32.xlu1 %v3492_v31, %s6053_s29 }
 0x35c   : > { %4475 = vrot.lane.b32.xlu0 %v3494_v48, %s6051_s21 }
 0x35f   : > { %4847 = vrot.lane.b32.xlu1 %v6491_v38, %s6053_s29 }
 0x360   : > { %4666 = vrot.lane.b32.xlu0 %v3494_v48, %s6052_s27 }
 0x363   : > { %4845 = vrot.lane.b32.xlu1 %v6484_v36, %s6053_s29 }
 0x364   : > { %4857 = vrot.lane.b32.xlu0 %v3494_v48, %s6053_s29 }
 0x367   : > { %4839 = vrot.lane.b32.xlu1 %v6796_v32, %s6053_s29 }
 0x368   : > { %3545 = vrot.lane.b32.xlu0 %v3493_v5, %s6045_s11  ;;  %s5423_s11 = sshll.u32 %s375_s26, 4  ;;  %s5424_s11 = int_to_ptr.vmem [resolvable:$true] %s5423_s11 }
 0x369   : > { %p5985_p1 = scmp.lt.s32.totalorder %s5424_s11, %s5983_s19 }
 0x36b   : > { %4837 = vrot.lane.b32.xlu1 %v6832_v58, %s6053_s29 }
 0x36c   : > { %4660 = vrot.lane.b32.xlu0 %v5933_v53, %s6052_s27 }
 0x36f   : > { %5044 = vrot.lane.b32.xlu1 %v3492_v31, %s6054_s30 }
 0x370   : > { %3732 = vrot.lane.b32.xlu0 %v3493_v5, %s6048_s23 }
 0x373   : > { %5038 = vrot.lane.b32.xlu1 %v6491_v38, %s6054_s30 }
 0x374   : > { %3920 = vrot.lane.b32.xlu0 %v3493_v5, %s6046_s12 }
 0x377   : > { %4473 = vrot.lane.b32.xlu1 %v3493_v5, %s6051_s21  ;;  %s5409_s21 = scalar_lea.sflag [#allocation5], %s6198_s15 }
 0x378   : > { %4849 = vrot.lane.b32.xlu0 %v6502_v42, %s6053_s29 }
 0x37b   : > { %5036 = vrot.lane.b32.xlu1 %v6484_v36, %s6054_s30  ;;  %v7169_v36 = vpop.permute.xlu0 %4658 }
 0x37c   : > { %4111 = vrot.lane.b32.xlu0 %v3493_v5, %s6050_s20  ;;  %s5421_s20 = scalar_lea.hbm %s7606_s10, %s5870_s28 }
 0x37f   : > { %4664 = vrot.lane.b32.xlu1 %v3493_v5, %s6052_s27  ;;  %v7175_v38 = vpop.permute.xlu0 %4461 }
 0x380   : > { %4652 = vrot.lane.b32.xlu0 %v5934_v40, %s6052_s27  ;;  %s5978_s27 = scalar_lea.vmem %s5424_s11, 384 }
 0x381   : > { %p5979_p11 = scmp.ne.s32.totalorder %s5424_s11, %s5978_s27 }
 0x383   : > { %4855 = vrot.lane.b32.xlu1 %v3493_v5, %s6053_s29  ;;  %p5980_p13 = pnand %p5979_p11, %p7689_p12 }
 0x384   : > { %4841 = vrot.lane.b32.xlu0 %v6865_v30, %s6053_s29 }
 0x385   : > { %p5981_p0 = pneg %p5980_p13 }
 0x387   : > { %5030 = vrot.lane.b32.xlu1 %v6796_v32, %s6054_s30  ;;  %v7178_v32 = vpop.permute.xlu0 %4650 }
 0x388   : > { %4859 = vrot.lane.b32.xlu0 %v6706_v29, %s6053_s29 }
 0x38b   : > { %5046 = vrot.lane.b32.xlu1 %v3493_v5, %s6054_s30 }
 0x38c   : > { %5048 = vrot.lane.b32.xlu0 %v3494_v48, %s6054_s30  ;;  %v7664_v48 = vmov 0.0  }
 0x38f   : > { %5028 = vrot.lane.b32.xlu1 %v6832_v58, %s6054_s30  ;;  %v7184_v58 = vpop.permute.xlu0 %4668 }
 0x390   : > { %4851 = vrot.lane.b32.xlu0 %v5933_v53, %s6053_s29 }
 0x393   : > { %5042 = vrot.lane.b32.xlu1 %v5933_v53, %s6054_s30  ;;  %v3725_v10 = vpop.permute.xlu0 %3724  ;;  %v3553_v53 = vsel %vm403_vm1, %v7005_v26, %v7095_v1  ;;  %v5550_v1 = vld [vmem:[%s7602_s6 + $0x8] sm:$0xff] }
 0x394   : > { %5040 = vrot.lane.b32.xlu0 %v6502_v42, %s6054_s30  ;;  %v5248_v42 = vld [vmem:[%s7605_s9] sm:$0xff] }
 0x397   : > { %5220 = vperm.xlu1 %5929, %v5217_v16   ;;  %v7193_v21 = vpop.permute.xlu0 %3912 }
 0x398   : > { %4843 = vrot.lane.b32.xlu0 %v5934_v40, %s6053_s29  ;;  %s5984_s29 = scalar_lea.vmem %s5983_s19, 768 }
 0x399   : > { %p5986_p3 = scmp.lt.s32.totalorder %s5984_s29, %s5978_s27 }
 0x39b   : > { %v7195_v7 = vpop.permute.xlu0 %4103  ;;  %p5987_p8 = por %p5986_p3, %p5985_p1 }
 0x39c   : > { %5032 = vrot.lane.b32.xlu0 %v6865_v30, %s6054_s30 }
 0x39d   : > { %p5988_p10 = pnand %p5987_p8, %p5981_p0 }
 0x39f   : > { %v7197_v8 = vpop.permute.xlu0 %4465 }
 0x3a0   : > { %5050 = vrot.lane.b32.xlu0 %v6706_v29, %s6054_s30 }
 0x3a4   : > { %5034 = vrot.lane.b32.xlu0 %v5934_v40, %s6054_s30  ;;  %v3552_v40 = vsel %vm403_vm1, %v7017_v20, %v7005_v26  ;;  %v3549_v26 = vsel %vm403_vm1, %v6987_v52, %v6969_v50  ;;  %v3741_v52 = vsel %vm563_vm3, %v3725_v10, %v7041_v57  ;;  %v3737_v57 = vsel %vm563_vm3, %v7027_v9, %v7037_v6 }
 0x3a8   : > { %5251 = vperm.xlu0 %5928, %v5248_v42  }
 0x3b5   : > { %v3544_v29 = vpop.permute.xlu1 %3543 }
 0x3b6   : > { %v3555_v2 = vsel %vm403_vm1, %v6946_v46, %v3544_v29  ;;  %v3551_v46 = vsel %vm403_vm1, %v7025_v45, %v7033_v62 }
 0x3b9   : > { %v3731_v17 = vpop.permute.xlu1 %3730 }
 0x3ba   : > { %v3742_v50 = vsel %vm563_vm3, %v7003_v3, %v3731_v17  ;;  %v3738_v3 = vsel %vm563_vm3, %v7037_v6, %v7045_v44 }
 0x3bd   : > { %v7199_v37 = vpop.permute.xlu1 %3918 }
 0x3be   : > { %v3548_v49 = vpop.permute.xlu0 %3547 }
 0x3c1   : > { %v7201_v12 = vpop.permute.xlu1 %4109 }
 0x3c2   : > { %v3735_v11 = vpop.permute.xlu0 %3734 }
 0x3c5   : > { %v7203_v24 = vpop.permute.xlu1 %4471 }
 0x3c6   : > { %v7205_v14 = vpop.permute.xlu0 %3922 }
 0x3c9   : > { %v7207_v63 = vpop.permute.xlu1 %4662 }
 0x3ca   : > { %v7209_v43 = vpop.permute.xlu0 %4113 }
 0x3cd   : > { %v7211_v55 = vpop.permute.xlu1 %4853 }
 0x3ce   : > { %v7213_v47 = vpop.permute.xlu0 %4475 }
 0x3d1   : > { %v7215_v23 = vpop.permute.xlu1 %4847 }
 0x3d2   : > { %v7217_v28 = vpop.permute.xlu0 %4666 }
 0x3d5   : > { %v7219_v31 = vpop.permute.xlu1 %4845 }
 0x3d6   : > { %v7221_v56 = vpop.permute.xlu0 %4857 }
 0x3d9   : > { %v7223_v5 = vpop.permute.xlu1 %4839 }
 0x3da   : > { %v3546_v51 = vpop.permute.xlu0 %3545 }
 0x3db   : > { %v3557_v25 = vsel %vm403_vm1, %v3546_v51, %v3548_v49  ;;  %v3556_v34 = vsel %vm403_vm1, %v3544_v29, %v3546_v51  ;;  %v3740_v29 = vsel %vm563_vm3, %v7015_v18, %v3725_v10  ;;  %v3739_v49 = vsel %vm563_vm3, %v7023_v0, %v7015_v18  ;;  %v3498_v18 = vld [vmem:[%s7602_s6] sm:$0xff] }
 0x3dc   : > { %3597 = vmatprep.subr.mxu0 %v3556_v34  ;;  %5776 = vmatpush3.msra.mxu1 %v3557_v25  ;;  %v3736_v0 = vsel %vm563_vm3, %v7031_v60, %v7027_v9  ;;  %v3930_v9 = vsel %vm724_vm4, %v7035_v35, %v7199_v37  ;;  %v3929_v60 = vsel %vm724_vm4, %v7193_v21, %v7053_v39  ;;  %v7665_v35 = vld [vmem:[#allocation16_spill] sm:$0xff]  ;;  %v7666_v34 = vld [vmem:[#allocation15_spill] sm:$0xff] }
 0x3dd   : > { %3598 = vmatpush1.msra.mxu0 %v3555_v2  ;;  %5777 = vmatprep.subr.mxu1 %v7664_v48  ;;  %v7254_v20 = vpop.permute.xlu1 %4837  ;;  %v3927_v51 = vsel %vm724_vm4, %v7043_v27, %v7039_v41  ;;  %v7667_v27 = vld [vmem:[#allocation17_spill] sm:$0xff] }
 0x3de   : > { %v7239_v16 = vpop.permute.xlu0 %4660  ;;  %3599 = vmatprep.subr.mxu0 %v3553_v53  ;;  %5778 = vmatpush3.msra.mxu1 %v3554_v4  ;;  %v3924_v2 = vsel %vm724_vm4, %v7667_v27, %v7666_v34 }
 0x3df   : > { %3600 = vmatpush1.msra.mxu0 %v3552_v40  ;;  %5779 = vmatprep.subr.mxu1 %v7664_v48  ;;  %v7668_v40 = vld [vmem:[#allocation18_spill] sm:$0xff] }
 0x3e0   : > { %3601 = vmatprep.subr.mxu0 %v3550_v59  ;;  %5780 = vmatpush3.msra.mxu1 %v3551_v46  ;;  %v7669_v59 = vld [vmem:[#allocation28_spill] sm:$0xff] }
 0x3e1   : > { %3602 = vmatpush1.msra.mxu0 %v3549_v26  ;;  %5784 = vmatprep.subr.mxu1 %v7664_v48  ;;  %v7670_v26 = vld [vmem:[#allocation19_spill] sm:$0xff] }
 0x3e2   : > { %v3733_v62 = vpop.permute.xlu0 %3732  ;;  %5782 = vmatmul.mubr.msk.f32.vlgmr.msra.gmra.mxu1 %vm3567_vm15, %v5550_v1  ;;  %5551 = vmatmul.mubr.msk.f32.vlgmr.msra.gmra.mxu0 %vm3567_vm15, %v5550_v1  ;;  %v4120_v1 = vsel %vm888_vm5, %v7195_v7, %v7669_v59  ;;  %v5564_v59 = vld [vmem:[%s7602_s6 + $0x28] sm:$0xff] }
 0x3e3   : > { %v3744_v45 = vsel %vm563_vm3, %v3733_v62, %v3735_v11  ;;  %v3743_v42 = vsel %vm563_vm3, %v3731_v17, %v3733_v62  ;;  %3821 = vmatprep.mubr.f32.mxu0 %v7664_v48  ;;  %5790 = vmatprep.mubr.msk.f32.mxu1 %vm6049_vm0, %v7664_v48  ;;  %v7277_v17 = vpop.permute.xlu1 %5044  ;;  %v4119_v62 = vsel %vm888_vm5, %v7670_v26, %v7195_v7  ;;  %v7675_v7 = vld [vmem:[#allocation25_spill] sm:$0xff] }
 0x3e4   : > { %3783 = vmatprep.subr.mxu0 %v3743_v42  ;;  %5785 = vmatpush3.msra.mxu1 %v3744_v45  ;;  %v7671_v45 = vld [vmem:[#allocation22_spill] sm:$0xff]  ;;  %v7672_v42 = vld [vmem:[#allocation20_spill] sm:$0xff] }
 0x3e5   : > { %3784 = vmatpush1.msra.mxu0 %v3742_v50  ;;  %5786 = vmatprep.subr.mxu1 %v7664_v48  ;;  %v7673_v50 = vld [vmem:[#allocation21_spill] sm:$0xff] }
 0x3e6   : > { %v3921_v11 = vpop.permute.xlu0 %3920  ;;  %3785 = vmatprep.subr.mxu0 %v3740_v29  ;;  %5787 = vmatpush3.msra.mxu1 %v3741_v52  ;;  %v7674_v52 = vld [vmem:[#allocation23_spill] sm:$0xff] }
 0x3e7   : > { %3786 = vmatpush1.msra.mxu0 %v3739_v49  ;;  %5788 = vmatprep.subr.mxu1 %v7664_v48  ;;  %v3932_v44 = vsel %vm724_vm4, %v3921_v11, %v7205_v14  ;;  %v3931_v6 = vsel %vm724_vm4, %v7199_v37, %v3921_v11  ;;  %v3928_v14 = vsel %vm724_vm4, %v7039_v41, %v7193_v21  ;;  %v7311_v25 = vpop.permute.xlu1 %5038  ;;  %v5555_v41 = vld [vmem:[%s7602_s6 + $0x10] sm:$0xff]  ;;  %v5558_v49 = vld [vmem:[%s7602_s6 + $0x18] sm:$0xff] }
 0x3e8   : > { %3787 = vmatprep.subr.mxu0 %v3737_v57  ;;  %5789 = vmatpush3.msra.mxu1 %v3738_v3  ;;  %v3926_v37 = vsel %vm724_vm4, %v7665_v35, %v7057_v19  ;;  %v3925_v21 = vsel %vm724_vm4, %v7666_v34, %v7665_v35  ;;  %v4116_v29 = vsel %vm888_vm5, %v7674_v52, %v7672_v42  ;;  %v7677_v35 = vld [vmem:[#allocation14_spill] sm:$0xff] }
 0x3e9   : > { %3788 = vmatpush1.msra.mxu0 %v3736_v0  ;;  %5793 = vmatprep.subr.mxu1 %v7664_v48  ;;  %v4115_v3 = vsel %vm888_vm5, %v7675_v7, %v7674_v52  ;;  %v5935_v0 = vld [vmem:[#allocation2 + $0x70] sm:$0xff] }
 0x3ea   : > { %v7292_v10 = vpop.permute.xlu0 %4849  ;;  %5553 = vmatmul.mubr.msk.f32.vlgmr.msra.gmra.mxu0 %vm3567_vm15, %v3498_v18  ;;  %5791 = vmatmul.mubr.msk.f32.vlgmr.msra.gmra.mxu1 %vm3567_vm15, %v3498_v18 }
 0x3eb   : > { %3971 = vmatprep.subr.mxu0 %v3931_v6  ;;  %5794 = vmatpush3.msra.mxu1 %v3932_v44  ;;  %v4474_v46 = vpop.permute.xlu1 %4473  ;;  %v5936_v44 = vld [vmem:[#allocation2 + $0x88] sm:$0xff]  ;;  %v5937_v6 = vld [vmem:[#allocation2 + $0x10] sm:$0xff] }
 0x3ec   : > { %3972 = vmatpush1.msra.mxu0 %v3930_v9  ;;  %5795 = vmatprep.subr.mxu1 %v7664_v48  ;;  %v5561_v9 = vld [vmem:[%s7602_s6 + $0x20] sm:$0xff] }
 0x3ed   : > { %3973 = vmatprep.subr.mxu0 %v3928_v14  ;;  %5796 = vmatpush3.msra.mxu1 %v3929_v60 }
 0x3ee   : > { %3974 = vmatpush1.msra.mxu0 %v3927_v51  ;;  %5797 = vmatprep.subr.mxu1 %v7664_v48  ;;  %v4112_v39 = vpop.permute.xlu0 %4111  ;;  %v7676_v51 = vld [vmem:[#allocation13_spill] sm:$0xff] }
 0x3ef   : > { %3975 = vmatprep.subr.mxu0 %v3925_v21  ;;  %5798 = vmatpush3.msra.mxu1 %v3926_v37  ;;  %v4123_v19 = vsel %vm888_vm5, %v4112_v39, %v7209_v43  ;;  %v4122_v4 = vsel %vm888_vm5, %v7201_v12, %v4112_v39  ;;  %v4121_v43 = vsel %vm888_vm5, %v7668_v40, %v7201_v12  ;;  %v7366_v57 = vpop.permute.xlu1 %5036  ;;  %v7678_v37 = vld [vmem:[#allocation27_spill] sm:$0xff]  ;;  %v7682_v40 = vld [vmem:[#allocation26_spill] sm:$0xff] }
 0x3f0   : > { %5799 = vmatprep.mubr.msk.f32.mxu1 %vm6049_vm0, %v7664_v48  ;;  %3976 = vmatpush1.msra.mxu0 %v3924_v2  ;;  %v4117_v12 = vsel %vm888_vm5, %v7672_v42, %v7671_v45  ;;  %v4487_v39 = vsel %vm1209_vm6, %v7213_v47, %v7678_v37  ;;  %v4485_v21 = vsel %vm1209_vm6, %v7203_v24, %v4474_v46  ;;  %v7680_v2 = vld [vmem:[#allocation24_spill] sm:$0xff] }
 0x3f1   : > { %4009 = vmatprep.mubr.f32.mxu0 %v7664_v48  ;;  %5800 = vmatmul.mubr.msk.f32.vlgmr.msra.gmra.mxu1 %vm3567_vm15, %v5555_v41  ;;  %v4481_v24 = vsel %vm1209_vm6, %v7682_v40, %v7175_v38  ;;  %v4678_v38 = vsel %vm1373_vm7, %v7217_v28, %v7184_v58  ;;  %v7685_v58 = vld [vmem:[#allocation35_spill] sm:$0xff] }
 0x3f2   : > { %5802 = vmatprep.subr.mxu1 %v7664_v48  ;;  %5556 = vmatmul.mubr.msk.f32.vlgmr.msra.gmra.mxu0 %vm3567_vm15, %v5555_v41  ;;  %v7336_v53 = vpop.permute.xlu0 %4652  ;;  %v7679_v41 = vld [vmem:[#allocation29_spill] sm:$0xff]  ;;  %v4674_v52 = vsel %vm1373_vm7, %v7685_v58, %v7169_v36 }
 0x3f3   : > { %4162 = vmatprep.subr.mxu0 %v4122_v4  ;;  %5803 = vmatpush3.msra.mxu1 %v4123_v19  ;;  %v4665_v14 = vpop.permute.xlu1 %4664  ;;  %v4483_v27 = vsel %vm1209_vm6, %v7197_v8, %v7679_v41  ;;  %v4482_v19 = vsel %vm1209_vm6, %v7680_v2, %v7197_v8 }
 0x3f4   : > { %4163 = vmatpush1.msra.mxu0 %v4121_v43  ;;  %5804 = vmatprep.subr.mxu1 %v7664_v48  ;;  %v7683_v43 = vld [vmem:[#allocation31_spill] sm:$0xff]  ;;  %v4676_v42 = vsel %vm1373_vm7, %v7207_v63, %v4665_v14  ;;  %v4672_v63 = vsel %vm1373_vm7, %v7178_v32, %v7336_v53 }
 0x3f5   : > { %4164 = vmatprep.subr.mxu0 %v4119_v62  ;;  %5805 = vmatpush3.msra.mxu1 %v4120_v1  ;;  %v7684_v1 = vld [vmem:[#allocation32_spill] sm:$0xff]  ;;  %v4677_v62 = vsel %vm1373_vm7, %v4665_v14, %v7217_v28 }
 0x3f6   : > { %4165 = vmatpush1.msra.mxu0 %v7673_v50  ;;  %5806 = vmatprep.subr.mxu1 %v7664_v48  ;;  %v7359_v11 = vpop.permute.xlu0 %4841  ;;  %v4479_v26 = vsel %vm1209_vm6, %v7684_v1, %v7683_v43  ;;  %v4675_v50 = vsel %vm1373_vm7, %v7169_v36, %v7239_v16  ;;  %v7686_v28 = vld [vmem:[#allocation36_spill] sm:$0xff]  ;;  %v7688_v36 = vld [vmem:[#allocation34_spill] sm:$0xff] }
 0x3f7   : > { %4166 = vmatprep.subr.mxu0 %v4116_v29  ;;  %5807 = vmatpush3.msra.mxu1 %v4117_v12  ;;  %v4856_v4 = vpop.permute.xlu1 %4855  ;;  %v7687_v29 = vld [vmem:[#allocation33_spill] sm:$0xff] }
 0x3f8   : > { %5808 = vmatprep.mubr.msk.f32.mxu1 %vm6049_vm0, %v7664_v48  ;;  %4167 = vmatpush1.msra.mxu0 %v4115_v3  ;;  %v4671_v16 = vsel %vm1373_vm7, %v7687_v29, %v7178_v32  ;;  %v4670_v7 = vsel %vm1373_vm7, %v7688_v36, %v7687_v29 }
 0x3f9   : > { %4200 = vmatprep.mubr.f32.mxu0 %v7664_v48  ;;  %5809 = vmatmul.mubr.msk.f32.vlgmr.msra.gmra.mxu1 %vm3567_vm15, %v5558_v49 }
 0x3fa   : > { %5811 = vmatprep.subr.mxu1 %v7664_v48  ;;  %5559 = vmatmul.mubr.msk.f32.vlgmr.msra.gmra.mxu0 %vm3567_vm15, %v5558_v49  ;;  %v7372_v18 = vpop.permute.xlu0 %4859  ;;  %v5567_v49 = vld [vmem:[%s7602_s6 + $0x30] sm:$0xff] }
 0x3fb   : > { %5941 = vmatprep.subr.msk.mxu0 %vm1881_vm12, %v7110_v61  ;;  %5942 = vmatpush3.msk.msra.mxu1 %vm1882_vm13, %v7118_v54  ;;  %v7442_v12 = vpop.permute.xlu1 %5030  ;;  %v4869_v32 = vsel %vm1537_vm8, %v7221_v56, %v7372_v18 }
 0x3fc   : > { %5943 = vmatpush1.msk.msra.mxu0 %vm1880_vm11, %v7104_v13  ;;  %5813 = vmatprep.subr.mxu1 %v7664_v48 }
 0x3fd   : > { %4313 = vmatprep.subr.mxu0 %v5935_v0  ;;  %5814 = vmatpush3.msra.mxu1 %v5936_v44  ;;  %v4868_v0 = vsel %vm1537_vm8, %v4856_v4, %v7221_v56  ;;  %v4867_v44 = vsel %vm1537_vm8, %v7211_v55, %v4856_v4  ;;  %v4864_v56 = vsel %vm1537_vm8, %v7219_v31, %v7215_v23 }
 0x3fe   : > { %4314 = vmatpush1.msra.mxu0 %v5937_v6  ;;  %5815 = vmatprep.subr.mxu1 %v7664_v48  ;;  %v7388_v60 = vpop.permute.xlu0 %5048 }
 0x3ff   : > { %4315 = vmatprep.subr.mxu0 %v7676_v51  ;;  %5816 = vmatpush3.msra.mxu1 %v6865_v30  ;;  %v4486_v30 = vsel %vm1209_vm6, %v4474_v46, %v7213_v47  ;;  %v7681_v47 = vld [vmem:[#allocation30_spill] sm:$0xff]  ;;  %v4480_v46 = vsel %vm1209_vm6, %v7683_v43, %v7682_v40  ;;  %v5047_v53 = vpop.permute.xlu1 %5046  ;;  %v4862_v51 = vsel %vm1537_vm8, %v7223_v5, %v7359_v11 }
 0x400   : > { %5817 = vmatprep.mubr.msk.f32.mxu1 %vm6049_vm0, %v7664_v48  ;;  %4316 = vmatpush1.msra.mxu0 %v7677_v35  ;;  %v5570_v35 = vld [vmem:[%s7602_s6 + $0x38] sm:$0xff]  ;;  %v5058_v31 = vsel %vm1701_vm9, %v7277_v17, %v5047_v53 }
 0x401   : > { %4349 = vmatprep.mubr.f32.mxu0 %v7664_v48  ;;  %5818 = vmatmul.mubr.msk.f32.vlgmr.msra.gmra.mxu1 %vm3567_vm15, %v5561_v9 }
 0x402   : > { %5820 = vmatprep.subr.mxu1 %v7664_v48  ;;  %5562 = vmatmul.mubr.msk.f32.vlgmr.msra.gmra.mxu0 %vm3567_vm15, %v5561_v9  ;;  %v4852_v34 = vpop.permute.xlu0 %4851  ;;  %v4865_v9 = vsel %vm1537_vm8, %v7215_v23, %v7292_v10  ;;  %v5059_v23 = vsel %vm1701_vm9, %v5047_v53, %v7388_v60 }
 0x403   : > { %4526 = vmatprep.subr.mxu0 %v4486_v30  ;;  %5821 = vmatpush3.msra.mxu1 %v4487_v39  ;;  %v4866_v6 = vsel %vm1537_vm8, %v7292_v10, %v4852_v34  ;;  %v5029_v55 = vpop.permute.xlu1 %5028  ;;  %v4861_v10 = vsel %vm1537_vm8, %v7254_v20, %v7223_v5  ;;  %v5055_v39 = vsel %vm1701_vm9, %v7366_v57, %v7311_v25 }
 0x404   : > { %4527 = vmatpush1.msra.mxu0 %v4485_v21  ;;  %5822 = vmatprep.subr.mxu1 %v7664_v48  ;;  %v5052_v30 = vsel %vm1701_vm9, %v5029_v55, %v7442_v12 }
 0x405   : > { %4528 = vmatprep.subr.mxu0 %v4483_v27  ;;  %5823 = vmatpush3.msra.mxu1 %v7681_v47 }
 0x406   : > { %4529 = vmatpush1.msra.mxu0 %v4482_v19  ;;  %5824 = vmatprep.subr.mxu1 %v7664_v48  ;;  %v7424_v8 = vpop.permute.xlu0 %5040 }
 0x407   : > { %4530 = vmatprep.subr.mxu0 %v4480_v46  ;;  %5825 = vmatpush3.msra.mxu1 %v4481_v24  ;;  %v5043_v20 = vpop.permute.xlu1 %5042 }
 0x408   : > { %5826 = vmatprep.mubr.msk.f32.mxu1 %vm6049_vm0, %v7664_v48  ;;  %4531 = vmatpush1.msra.mxu0 %v4479_v26  ;;  %v5057_v34 = vsel %vm1701_vm9, %v7424_v8, %v5043_v20 }
 0x409   : > { %4564 = vmatprep.mubr.f32.mxu0 %v7664_v48  ;;  %5827 = vmatmul.mubr.msk.f32.vlgmr.msra.gmra.mxu1 %vm3567_vm15, %v5564_v59 }
 0x40a   : > { %5829 = vmatprep.subr.mxu1 %v7664_v48  ;;  %5565 = vmatmul.mubr.msk.f32.vlgmr.msra.gmra.mxu0 %vm3567_vm15, %v5564_v59  ;;  %v4844_v45 = vpop.permute.xlu0 %4843 }
 0x40b   : > { %4717 = vmatprep.subr.mxu0 %v4677_v62  ;;  %5830 = vmatpush3.msra.mxu1 %v4678_v38  ;;  %v4863_v18 = vsel %vm1537_vm8, %v7359_v11, %v4844_v45  ;;  %v5056_v11 = vsel %vm1701_vm9, %v7311_v25, %v7424_v8 }
 0x40c   : > { %4718 = vmatpush1.msra.mxu0 %v4676_v42  ;;  %5831 = vmatprep.subr.mxu1 %v7664_v48 }
 0x40d   : > { %4719 = vmatprep.subr.mxu0 %v4674_v52  ;;  %5832 = vmatpush3.msra.mxu1 %v4675_v50 }
 0x40e   : > { %4720 = vmatpush1.msra.mxu0 %v7686_v28  ;;  %5833 = vmatprep.subr.mxu1 %v7664_v48  ;;  %v5033_v3 = vpop.permute.xlu0 %5032 }
 0x40f   : > { %4721 = vmatprep.subr.mxu0 %v4671_v16  ;;  %5834 = vmatpush3.msra.mxu1 %v4672_v63  ;;  %v5053_v17 = vsel %vm1701_vm9, %v7442_v12, %v5033_v3 }
 0x410   : > { %5835 = vmatprep.mubr.msk.f32.mxu1 %vm6049_vm0, %v7664_v48  ;;  %4722 = vmatpush1.msra.mxu0 %v4670_v7 }
 0x411   : > { %4755 = vmatprep.mubr.f32.mxu0 %v7664_v48  ;;  %5836 = vmatmul.mubr.msk.f32.vlgmr.msra.gmra.mxu1 %vm3567_vm15, %v5567_v49 }
 0x412   : > { %5838 = vmatprep.subr.mxu1 %v7664_v48  ;;  %5568 = vmatmul.mubr.msk.f32.vlgmr.msra.gmra.mxu0 %vm3567_vm15, %v5567_v49  ;;  %v5051_v14 = vpop.permute.xlu0 %5050 }
 0x413   : > { %4908 = vmatprep.subr.mxu0 %v4868_v0  ;;  %5839 = vmatpush3.msra.mxu1 %v4869_v32  ;;  %v5060_v5 = vsel %vm1701_vm9, %v7388_v60, %v5051_v14  ;;  %v5573_v60 = vld [vmem:[%s7602_s6 + $0x40] sm:$0xff] }
 0x414   : > { %4909 = vmatpush1.msra.mxu0 %v4867_v44  ;;  %5840 = vmatprep.subr.mxu1 %v7664_v48 }
 0x415   : > { %4910 = vmatprep.subr.mxu0 %v4865_v9  ;;  %5841 = vmatpush3.msra.mxu1 %v4866_v6 }
 0x416   : > { %4911 = vmatpush1.msra.mxu0 %v4864_v56  ;;  %5842 = vmatprep.subr.mxu1 %v7664_v48  ;;  %v5035_v37 = vpop.permute.xlu0 %5034 }
 0x417   : > { %4912 = vmatprep.subr.mxu0 %v4862_v51  ;;  %5843 = vmatpush3.msra.mxu1 %v4863_v18  ;;  %v5054_v25 = vsel %vm1701_vm9, %v5033_v3, %v5035_v37 }
 0x418   : > { %5844 = vmatprep.mubr.msk.f32.mxu1 %vm6049_vm0, %v7664_v48  ;;  %4913 = vmatpush1.msra.mxu0 %v4861_v10 }
 0x419   : > { %4946 = vmatprep.mubr.f32.mxu0 %v7664_v48  ;;  %5845 = vmatmul.mubr.msk.f32.vlgmr.msra.gmra.mxu1 %vm3567_vm15, %v5570_v35 }
 0x41a   : > { %5571 = vmatmul.mubr.msk.f32.vlgmr.msra.gmra.mxu0 %vm3567_vm15, %v5570_v35  ;;  %5099 = vmatprep.subr.mxu0 %v5059_v23 }
 0x41b   : > { %5100 = vmatpush1.msra.mxu0 %v5058_v31  ;;  %5137 = vmatprep.mubr.f32.mxu0 %v7664_v48 }
 0x41c   : > { %5101 = vmatprep.subr.mxu0 %v5056_v11  ;;  %5847 = vmatprep.subr.mxu1 %v7664_v48 }
 0x41d   : > { %5102 = vmatpush1.msra.mxu0 %v5055_v39  ;;  %5848 = vmatpush3.msra.mxu1 %v5060_v5 }
 0x41e   : > { %5103 = vmatprep.subr.mxu0 %v5053_v17  ;;  %5849 = vmatprep.subr.mxu1 %v7664_v48  ;;  %v5221_v17 = vpop.permute.xlu1 %5220 }
 0x41f   : > { %5104 = vmatpush1.msra.mxu0 %v5052_v30  ;;  %5850 = vmatpush3.msra.mxu1 %v5057_v34 }
 0x420   : > { %5574 = vmatmul.mubr.msk.f32.vlgmr.msra.gmra.mxu0 %vm3567_vm15, %v5573_v60  ;;  %5851 = vmatprep.subr.mxu1 %v7664_v48 }
 0x421   : > { %5852 = vmatpush3.msra.mxu1 %v5054_v25  ;;  %5853 = vmatprep.mubr.msk.f32.mxu1 %vm6049_vm0, %v7664_v48 }
 0x422   : > { %5854 = vmatmul.mubr.msk.f32.vlgmr.msra.gmra.mxu1 %vm3567_vm15, %v5573_v60  ;;  %5856 = vmatprep.subr.mxu1 %v7664_v48 }
 0x423   : > { %5322 = vmatprep.mubr.f32.mxu0 %v7664_v48  ;;  %5864 = vmatprep.mubr.msk.f32.mxu1 %vm6049_vm0, %v7664_v48  ;;  %vm5254_vm0 = vcmask 261120   ;;  %v5252_v15 = vpop.permute.xlu0 %5251 }
 0x4a2   : > { %v3708_v57 = vpop.f32.mrf.mxu1  ;;  %v3637_v2 = vpop.f32.mrf.mxu0 }
 0x4a4   : > { %v5783_v21 = vpop.f32.mrf.mxu1  ;;  %v3639_v47 = vpop.f32.mrf.mxu0 }
 0x4aa   : > { %v3894_v41 = vpop.f32.mrf.mxu1  ;;  %v3823_v40 = vpop.f32.mrf.mxu0 }
 0x4ab   : > { %v3824_v28 = vadd.f32 %v3823_v40, %v3637_v2  ;;  %v3895_v49 = vadd.f32 %v3894_v41, %v3708_v57 }
 0x4ac   : > { %v5792_v27 = vpop.f32.mrf.mxu1  ;;  %v3825_v43 = vpop.f32.mrf.mxu0 }
 0x4ad   : > { %v3826_v36 = vadd.f32 %v3825_v43, %v3639_v47  ;;  %v5239_v43 = vld [vmem:[#allocation2 + $0x70] sm:$0xff] }
 0x4b1   : > { %v4082_v19 = vpop.f32.mrf.mxu1 }
 0x4b2   : > { %v4011_v59 = vpop.f32.mrf.mxu0  ;;  %v4088_v3 = vadd.f32 %v4082_v19, %v3895_v49 }
 0x4b3   : > { %v5801_v4 = vpop.f32.mrf.mxu1  ;;  %v4086_v7 = vadd.f32 %v4011_v59, %v3824_v28  ;;  %v5240_v59 = vld [vmem:[#allocation2 + $0x88] sm:$0xff] }
 0x4b4   : > { %v4013_v8 = vpop.f32.mrf.mxu0 }
 0x4b5   : > { %v4087_v53 = vadd.f32 %v4013_v8, %v3826_v36  ;;  %v5237_v8 = vld [vmem:[#allocation2 + $0x80] sm:$0xff] }
 0x4b9   : > { %v4273_v24 = vpop.f32.mrf.mxu1 }
 0x4ba   : > { %v4202_v26 = vpop.f32.mrf.mxu0  ;;  %v4279_v44 = vadd.f32 %v4273_v24, %v4088_v3 }
 0x4bb   : > { %v5810_v46 = vpop.f32.mrf.mxu1  ;;  %v4277_v32 = vadd.f32 %v4202_v26, %v4086_v7  ;;  %v5235_v26 = vld [vmem:[#allocation2 + $0x8] sm:$0xff] }
 0x4bc   : > { %v4204_v62 = vpop.f32.mrf.mxu0  ;;  %v5236_v46 = vld [vmem:[#allocation2 + $0x40] sm:$0xff] }
 0x4bd   : > { %v4278_v6 = vadd.f32 %v4204_v62, %v4087_v53 }
 0x4c1   : > { %v4422_v1 = vpop.f32.mrf.mxu1 }
 0x4c2   : > { %v4351_v45 = vpop.f32.mrf.mxu0  ;;  %v4428_v55 = vadd.f32 %v4422_v1, %v4279_v44  ;;  %v5238_v1 = vld [vmem:[#allocation2 + $0x10] sm:$0xff] }
 0x4c3   : > { %v5819_v38 = vpop.f32.mrf.mxu1  ;;  %v4426_v18 = vadd.f32 %v4351_v45, %v4277_v32 }
 0x4c4   : > { %v4353_v50 = vpop.f32.mrf.mxu0 }
 0x4c5   : > { %v4427_v14 = vadd.f32 %v4353_v50, %v4278_v6 }
 0x4c9   : > { %v4637_v42 = vpop.f32.mrf.mxu1 }
 0x4ca   : > { %v4566_v58 = vpop.f32.mrf.mxu0  ;;  %v4643_v10 = vadd.f32 %v4637_v42, %v4428_v55 }
 0x4cb   : > { %v5828_v12 = vpop.f32.mrf.mxu1  ;;  %v4641_v51 = vadd.f32 %v4566_v58, %v4426_v18 }
 0x4cc   : > { %v4568_v63 = vpop.f32.mrf.mxu0 }
 0x4cd   : > { %v4642_v23 = vadd.f32 %v4568_v63, %v4427_v14 }
 0x4d1   : > { %v4828_v52 = vpop.f32.mrf.mxu1 }
 0x4d2   : > { %v4757_v16 = vpop.f32.mrf.mxu0  ;;  %v4834_v20 = vadd.f32 %v4828_v52, %v4643_v10 }
 0x4d3   : > { %v5837_v29 = vpop.f32.mrf.mxu1  ;;  %v4832_v31 = vadd.f32 %v4757_v16, %v4641_v51 }
 0x4d4   : > { %v4759_v0 = vpop.f32.mrf.mxu0 }
 0x4d5   : > { %v4833_v11 = vadd.f32 %v4759_v0, %v4642_v23 }
 0x4d9   : > { %v5019_v9 = vpop.f32.mrf.mxu1 }
 0x4da   : > { %v4948_v56 = vpop.f32.mrf.mxu0  ;;  %v5025_v60 = vadd.f32 %v5019_v9, %v4834_v20 }
 0x4db   : > { %v5846_v35 = vpop.f32.mrf.mxu1  ;;  %v5023_v37 = vadd.f32 %v4948_v56, %v4832_v31 }
 0x4dc   : > { %v4950_v5 = vpop.f32.mrf.mxu0 }
 0x4dd   : > { %v5024_v30 = vadd.f32 %v4950_v5, %v4833_v11 }
 0x4e0   : > { %v5139_v39 = vpop.f32.mrf.mxu0 }
 0x4e1   : > { %v5214_v34 = vadd.f32 %v5139_v39, %v5023_v37 }
 0x4e2   : > { %v5141_v25 = vpop.f32.mrf.mxu0  ;;  %v5210_v57 = vpop.f32.mrf.mxu1 }
 0x4e3   : > { %v5215_v21 = vadd.f32 %v5141_v25, %v5024_v30  ;;  %v5223_v41 = vadd.f32 %v5221_v17, %v5214_v34  ;;  %v5216_v27 = vadd.f32 %v5210_v57, %v5025_v60 }
 0x4e4   : > { %v5855_v2 = vpop.f32.mrf.mxu1 }
 0x4e5   : > { %v5224_v19 = vadd.f32 %v5221_v17, %v5215_v21  ;;  %v5226_v4 = vmax.f32 %v5223_v41, 0.0  ;;  %v5225_v47 = vadd.f32 %v5221_v17, %v5216_v27 }
 0x4e7   : > { %v5227_v40 = vmax.f32 %v5224_v19, 0.0  ;;  %v5228_v24 = vmax.f32 %v5225_v47, 0.0 }
 0x4e9   : > { %5944 = vmatprep.subr.msk.mxu0 %vm1881_vm12, %v5227_v40  ;;  %5945 = vmatpush3.msk.msra.mxu1 %vm1882_vm13, %v5228_v24 }
 0x4ea   : > { %5946 = vmatpush1.msk.msra.mxu0 %vm1880_vm11, %v5226_v4  ;;  %5858 = vmatprep.subr.mxu1 %v7664_v48 }
 0x4eb   : > { %5947 = vmatprep.subr.msk.mxu0 %vm1881_vm12, %v7110_v61  ;;  %5948 = vmatpush3.msk.msra.mxu1 %vm1882_vm13, %v7118_v54 }
 0x4ec   : > { %5949 = vmatpush1.msk.msra.mxu0 %vm1880_vm11, %v7104_v13  ;;  %5860 = vmatprep.subr.mxu1 %v7664_v48 }
 0x4ed   : > { %5286 = vmatprep.subr.mxu0 %v5239_v43  ;;  %5861 = vmatpush3.msra.mxu1 %v5240_v59 }
 0x4ee   : > { %5287 = vmatpush1.msra.mxu0 %v5238_v1  ;;  %5862 = vmatprep.subr.mxu1 %v7664_v48 }
 0x4ef   : > { %5288 = vmatprep.subr.mxu0 %v5236_v46  ;;  %5863 = vmatpush3.msra.mxu1 %v5237_v8 }
 0x4f0   : > { %5289 = vmatpush1.msra.mxu0 %v5235_v26  ;;  %5865 = vmatmul.mubr.msk.f32.vlgmr.msra.gmra.mxu1 %vm5254_vm0, %v5247_v22 }
 0x4f1   : > { %5576 = vmatmul.mubr.msk.f32.vlgmr.msra.gmra.mxu0 %vm5254_vm0, %v5247_v22 }
 0x5b0   : > { %v5395_v33 = vpop.f32.mrf.mxu1 }
 0x5b1   : > { %v5324_v13 = vpop.f32.mrf.mxu0  ;;  %v5396_v61 = vadd.f32 %v5395_v33, %v5252_v15 }
 0x5b2   : > { %v5325_v54 = vadd.f32 %v5324_v13, %v5252_v15  ;;  %v5866_v38 = vpop.f32.mrf.mxu1 }
 0x5b3   : > { %v5326_v62 = vpop.f32.mrf.mxu0  ;;  %v5404_v45 = vadd.f32 %v5396_v61, %v5237_v8 }
 0x5b4   : > { %v5402_v48 = vadd.f32 %v5325_v54, %v5235_v26  ;;  %v5327_v42 = vadd.f32 %v5326_v62, %v5252_v15 }
 0x5b5   : > { %5407 = vst [vmem:[%s375_s26 + $0x10] sm:$0xff] %v5404_v45 }
 0x5b6   : > { %5405 = vst [vmem:[%s375_s26] sm:$0xff] %v5402_v48  ;;  %v5403_v12 = vadd.f32 %v5327_v42, %v5236_v46 }
 0x5b8   : > { %5406 = vst [vmem:[%s375_s26 + $0x8] sm:$0xff] %v5403_v12 }
 0x5b9   : > { %5991 = shalt.err (!%p5988_p10)
}
 0x5ba   : > { %s5992_s30 = scalar_lea.hbm %s5421_s20, 384  ;;  %s5996_s22 = scalar_lea.hbm %s7606_s10, 768 }
 0x5bb   : > { %p5993_p2 = scmp.ne.s32.totalorder %s5421_s20, %s5992_s30  ;;  %p5997_p7 = scmp.lt.s32.totalorder %s5421_s20, %s7606_s10 }
 0x5bc   : > { %p5998_p5 = scmp.lt.s32.totalorder %s5996_s22, %s5992_s30 }
 0x5bd   : > { %p5994_p4 = pnand %p5993_p2, %p7689_p12 }
 0x5be   : > { %p5999_p6 = por %p5998_p5, %p5997_p7 }
 0x5bf   : > { %p5995_p9 = pneg %p5994_p4 }
 0x5c1   : > { %p6000_p11 = pnand %p5999_p6, %p5995_p9 }
 0x5c3   : > { %6003 = shalt.err (!%p6000_p11)
}
 0x5c4   : > { %5873 = dma.vmem_to_hbm [thread:$0]  (%p7689_p12), %s5424_s11, 384, %s5421_s20, %s5409_s21  }
 0x5c5 PF: > { %s7690_s26 = sld [smem:[#allocation12_spill]]  ;;  %s5435_s12 = sand.u32 1, %s6030_s13  }
 0x5c6   : > { %p7692_p0 = scmp.ge.s32.totalorder %s6042_s16, 2  ;;  %s5436_s23 = scalar_lea.sflag [#allocation5], %s5435_s12 }
 0x5cb   : > { %p7691_p13 = scmp.ne.s32.totalorder %s7690_s26, 0 }
 0x5cd   : > { %p5880_p1 = pnand %p7692_p0, %p7691_p13 }
 0x5cf   : > { %p5881_p3 = pneg %p5880_p1 }
 0x5d1   : > { %6025 = dma.done.wait (%p5881_p3), %s5436_s23, 384  }
 0x5d2   : > { %6027 = vsyncadd (%p5881_p3), %s5436_s23, 4294966912  ;;  %s7693_s16 = sld [smem:[#allocation10_spill]]  ;;  %s7696_s13 = smov %s6034_s14 }
 0x5d3   : > { %s7694_s27 = sld [smem:[#allocation9_spill]] }
 0x5d4   : > { %s7695_s15 = sld [smem:[#allocation11_spill]] }
 0x5d8   : > { %p23_p8 = scmp.ge.s32.totalorder %s7693_s16, 4  }
 0x5d9   : > { %s7697_s14 = smov %s7694_s27 }
 0x5da   :  { %25 = sbr.rel (!%p23_p8) target bundleno = 5 (0x5), region = 129 }
 0x5df   :  { %5441 = vsyncpa [#allocation4], 1 }
 0x5e0   :  { %5443 = vsyncpa [#allocation4 + $0x1], 1 }
 0x5e1   :  { %5444 = vsyncpa [#allocation5], 1 }
 0x5e2   :  { %5446 = vsyncpa [#allocation5 + $0x1], 1 }

</bundles_post_ra>
